<compile_context>
chip_gen: v7x
topology: tpu7x:2x2x1
jax: 0.10.0
libtpu: 0.0.40
codegen_flags: <defaults>
</compile_context>

<pallas_src>
import jax
import jax.numpy as jnp
from jax.experimental import pallas as pl
from jax.experimental.pallas import tpu as pltpu


def decoder_kernel(x_ref, wih1_ref, whh1_ref, b1_ref,
                   wih2_ref, whh2_ref, b2_ref,
                   wout_ref, bout_ref,
                   y_ref, hs_ref):
    D = x_ref.shape[1]         # input_dim == rnn1 hidden size
    H = whh2_ref.shape[0]      # hidden_dim == 2 * input_dim
    seq_len = y_ref.shape[0]

    whh1 = whh1_ref[...]
    wih2 = wih2_ref[...]
    whh2 = whh2_ref[...]
    b2 = b2_ref[...]

    def cell(gates, c, hdim):
        # gate columns are [i, f, o, g]: one contiguous sigmoid + one tanh.
        s = jax.nn.sigmoid(gates[:, :3 * hdim])
        g = jnp.tanh(gates[:, 3 * hdim:])
        i = s[:, :hdim]
        f = s[:, hdim:2 * hdim]
        o = s[:, 2 * hdim:]
        c_new = f * c + i * g
        return o * jnp.tanh(c_new), c_new

    def cell_first(gates, hdim):
        # t == 0: c == 0, so the forget-gate term vanishes.
        s = jax.nn.sigmoid(gates[:, :3 * hdim])
        g = jnp.tanh(gates[:, 3 * hdim:])
        i = s[:, :hdim]
        o = s[:, 2 * hdim:]
        c_new = i * g
        return o * jnp.tanh(c_new), c_new

    # The decoder input is x repeated along time, so rnn1's input-to-hidden
    # contribution is constant across steps: compute it once.
    xg1 = jnp.dot(x_ref[...], wih1_ref[...],
                  preferred_element_type=jnp.float32) + b1_ref[...]

    # ---- t = 0 (peeled: all states start at zero -> both h@W_hh matmuls drop) ----
    h1, c1 = cell_first(xg1, D)
    h2, c2 = cell_first(
        jnp.dot(h1, wih2, preferred_element_type=jnp.float32) + b2, H)
    hs_ref[pl.ds(0, 1), :] = h2

    # ---- t = 1 .. seq_len-1: static unroll; states live in vregs ----
    for t in range(1, seq_len):
        # Only depends on last step's h2 -> overlaps with the rnn1 work below.
        g2_h = jnp.dot(h2, whh2, preferred_element_type=jnp.float32) + b2
        gates1 = xg1 + jnp.dot(h1, whh1, preferred_element_type=jnp.float32)
        h1, c1 = cell(gates1, c1, D)
        gates2 = g2_h + jnp.dot(h1, wih2, preferred_element_type=jnp.float32)
        h2, c2 = cell(gates2, c2, H)
        hs_ref[pl.ds(t, 1), :] = h2     # staging store, off the recurrence chain

    # Single output projection + single store.
    y_ref[...] = (jnp.dot(hs_ref[...], wout_ref[...],
                          preferred_element_type=jnp.float32) + bout_ref[...])


def decoder_forward(x, kernel_params, seq_len, n_features):
    # The PyTorch Decoder's reshape of the LSTM output is only valid for
    # n_features == 1; anything else silently changes semantics.
    assert n_features == 1, "Decoder semantics require n_features == 1"
    wih1, whh1, b1, wih2, whh2, b2, wout, bout = kernel_params
    H = whh2.shape[0]

    in_arrs = (x, wih1, whh1, b1, wih2, whh2, b2, wout, bout)
    # Whole model + activations is ~100 KiB: trivial whole-array VMEM blocks,
    # no grid, no pipelining needed.
    return pl.pallas_call(
        decoder_kernel,
        out_shape=jax.ShapeDtypeStruct((seq_len, n_features), jnp.float32),
        in_specs=[pl.BlockSpec(memory_space=pltpu.MemorySpace.VMEM)
                  for _ in in_arrs],
        out_specs=pl.BlockSpec(memory_space=pltpu.MemorySpace.VMEM),
        scratch_shapes=[pltpu.VMEM((seq_len, H), jnp.float32)],  # rnn2 outputs
    )(*in_arrs)


# -------- PyTorch-convention parameters, host-side packing, and pure-JAX reference --------
def init_params_pt(key, input_dim, n_features):
    """Parameters in PyTorch layout: LSTM weights (4h, in)/(4h, h) with gate order
    [i, f, g, o] and separate b_ih/b_hh; Linear weight (out, in), bias (out,)."""
    D, H = input_dim, 2 * input_dim
    ks = jax.random.split(key, 10)

    def u(k, shape, bound):
        return jax.random.uniform(k, shape, jnp.float32, -bound, bound)

    k1 = D ** -0.5
    k2 = H ** -0.5
    return dict(
        wih1=u(ks[0], (4 * D, D), k1), whh1=u(ks[1], (4 * D, D), k1),
        bih1=u(ks[2], (4 * D,), k1),   bhh1=u(ks[3], (4 * D,), k1),
        wih2=u(ks[4], (4 * H, D), k2), whh2=u(ks[5], (4 * H, H), k2),
        bih2=u(ks[6], (4 * H,), k2),   bhh2=u(ks[7], (4 * H,), k2),
        wout=u(ks[8], (n_features, H), k2), bout=u(ks[9], (n_features,), k2),
    )


def _ifgo_to_ifog(m):
    """Reorder the leading 4h axis from PyTorch's [i, f, g, o] to [i, f, o, g]."""
    h = m.shape[0] // 4
    return jnp.concatenate([m[:2 * h], m[3 * h:], m[2 * h:3 * h]], axis=0)


def pack_params(p):
    """PyTorch-layout params -> kernel layout (transposed, gate-reordered, fused bias)."""
    def lstm(w_ih, w_hh, b_ih, b_hh):
        return (_ifgo_to_ifog(w_ih).T,
                _ifgo_to_ifog(w_hh).T,
                _ifgo_to_ifog(b_ih + b_hh)[None, :])

    wih1, whh1, b1 = lstm(p["wih1"], p["whh1"], p["bih1"], p["bhh1"])
    wih2, whh2, b2 = lstm(p["wih2"], p["whh2"], p["bih2"], p["bhh2"])
    return (wih1, whh1, b1, wih2, whh2, b2, p["wout"].T, p["bout"][None, :])


def reference_forward(x, p, seq_len, n_features):
    """Pure-JAX re-implementation of Decoder.forward in PyTorch conventions."""
    D = x.shape[1]
    H = p["whh2"].shape[1]

    def lstm(xs, w_ih, w_hh, b_ih, b_hh, hdim):
        def step(carry, x_t):
            h, c = carry
            gates = x_t @ w_ih.T + b_ih + h @ w_hh.T + b_hh
            i = jax.nn.sigmoid(gates[:, :hdim])
            f = jax.nn.sigmoid(gates[:, hdim:2 * hdim])
            g = jnp.tanh(gates[:, 2 * hdim:3 * hdim])
            o = jax.nn.sigmoid(gates[:, 3 * hdim:])
            c = f * c + i * g
            h = o * jnp.tanh(c)
            return (h, c), h

        h0 = jnp.zeros((1, hdim), jnp.float32)
        c0 = jnp.zeros((1, hdim), jnp.float32)
        _, hs = jax.lax.scan(step, (h0, c0), xs)
        return hs                                      # (seq_len, 1, hdim)

    x_seq = jnp.broadcast_to(x, (seq_len, 1, D))       # x.repeat(seq_len, 1)
    hs1 = lstm(x_seq, p["wih1"], p["whh1"], p["bih1"], p["bhh1"], D)
    hs2 = lstm(hs1, p["wih2"], p["whh2"], p["bih2"], p["bhh2"], H)
    return hs2.reshape(seq_len, H) @ p["wout"].T + p["bout"]


if __name__ == "__main__":
    seq_len, input_dim, n_features = 8, 32, 1

    key = jax.random.PRNGKey(0)
    k_x, k_p = jax.random.split(key)
    x = jax.random.normal(k_x, (n_features, input_dim), jnp.float32)   # latent (1, D)
    pt_params = init_params_pt(k_p, input_dim, n_features)
    kernel_params = pack_params(pt_params)

    y = jax.block_until_ready(decoder_forward(x, kernel_params, seq_len, n_features))
    y_ref = jax.block_until_ready(reference_forward(x, pt_params, seq_len, n_features))

    assert y.shape == (seq_len, n_features)
    assert jnp.allclose(y, y_ref, atol=2e-3, rtol=2e-3), (y, y_ref)
    print("KERNEL_OK")
</pallas_src>

<mosaic_0001>
module attributes {stable_mosaic.version = 11 : i64} {
  func.func @decoder_kernel(%arg0: memref<1x32xf32, #tpu.memory_space<vmem>>, %arg1: memref<32x128xf32, #tpu.memory_space<vmem>>, %arg2: memref<32x128xf32, #tpu.memory_space<vmem>>, %arg3: memref<1x128xf32, #tpu.memory_space<vmem>>, %arg4: memref<32x256xf32, #tpu.memory_space<vmem>>, %arg5: memref<64x256xf32, #tpu.memory_space<vmem>>, %arg6: memref<1x256xf32, #tpu.memory_space<vmem>>, %arg7: memref<64x1xf32, #tpu.memory_space<vmem>>, %arg8: memref<1x1xf32, #tpu.memory_space<vmem>>, %arg9: memref<8x1xf32, #tpu.memory_space<vmem>>, %arg10: memref<8x64xf32, #tpu.memory_space<vmem>>) attributes {dimension_semantics = [], scalar_prefetch = 0 : i64, scratch_operands = 1 : i64, tpu.core_type = #tpu.core_type<tc>} {
    %c0 = arith.constant 0 : index
    %c0_0 = arith.constant 0 : index
    %0 = vector.load %arg2[%c0, %c0_0] : memref<32x128xf32, #tpu.memory_space<vmem>>, vector<32x128xf32>
    %c0_1 = arith.constant 0 : index
    %c0_2 = arith.constant 0 : index
    %1 = vector.load %arg4[%c0_1, %c0_2] : memref<32x256xf32, #tpu.memory_space<vmem>>, vector<32x256xf32>
    %c0_3 = arith.constant 0 : index
    %c0_4 = arith.constant 0 : index
    %2 = vector.load %arg5[%c0_3, %c0_4] : memref<64x256xf32, #tpu.memory_space<vmem>>, vector<64x256xf32>
    %c0_5 = arith.constant 0 : index
    %c0_6 = arith.constant 0 : index
    %3 = vector.load %arg6[%c0_5, %c0_6] : memref<1x256xf32, #tpu.memory_space<vmem>>, vector<1x256xf32>
    %c0_7 = arith.constant 0 : index
    %c0_8 = arith.constant 0 : index
    %4 = vector.load %arg0[%c0_7, %c0_8] : memref<1x32xf32, #tpu.memory_space<vmem>>, vector<1x32xf32>
    %c0_9 = arith.constant 0 : index
    %c0_10 = arith.constant 0 : index
    %5 = vector.load %arg1[%c0_9, %c0_10] : memref<32x128xf32, #tpu.memory_space<vmem>>, vector<32x128xf32>
    %cst = arith.constant dense<0.000000e+00> : vector<1x128xf32>
    %6 = tpu.matmul %4, %5, %cst {dimension_numbers = #tpu.dot_dimension_numbers<[1], [0], [0], [1], [0, 0, 1, 1], [], []>} : vector<1x32xf32>, vector<32x128xf32>, vector<1x128xf32> -> vector<1x128xf32>
    %c0_11 = arith.constant 0 : index
    %c0_12 = arith.constant 0 : index
    %7 = vector.load %arg3[%c0_11, %c0_12] : memref<1x128xf32, #tpu.memory_space<vmem>>, vector<1x128xf32>
    %8 = arith.addf %6, %7 : vector<1x128xf32>
    %9 = vector.extract_strided_slice %8 {offsets = [0, 0], sizes = [1, 96], strides = [1, 1]} : vector<1x128xf32> to vector<1x96xf32>
    %10 = arith.negf %9 : vector<1x96xf32>
    %11 = math.exp %10 : vector<1x96xf32>
    %cst_13 = arith.constant 1.000000e+00 : f32
    %12 = vector.broadcast %cst_13 : f32 to vector<1x96xf32>
    %13 = arith.addf %12, %11 : vector<1x96xf32>
    %14 = arith.divf %12, %13 : vector<1x96xf32>
    %15 = vector.extract_strided_slice %8 {offsets = [0, 96], sizes = [1, 32], strides = [1, 1]} : vector<1x128xf32> to vector<1x32xf32>
    %16 = math.tanh %15 : vector<1x32xf32>
    %17 = vector.extract_strided_slice %14 {offsets = [0, 0], sizes = [1, 32], strides = [1, 1]} : vector<1x96xf32> to vector<1x32xf32>
    %18 = vector.extract_strided_slice %14 {offsets = [0, 64], sizes = [1, 32], strides = [1, 1]} : vector<1x96xf32> to vector<1x32xf32>
    %19 = arith.mulf %17, %16 : vector<1x32xf32>
    %20 = math.tanh %19 : vector<1x32xf32>
    %21 = arith.mulf %18, %20 : vector<1x32xf32>
    %cst_14 = arith.constant dense<0.000000e+00> : vector<1x256xf32>
    %22 = tpu.matmul %21, %1, %cst_14 {dimension_numbers = #tpu.dot_dimension_numbers<[1], [0], [0], [1], [0, 0, 1, 1], [], []>} : vector<1x32xf32>, vector<32x256xf32>, vector<1x256xf32> -> vector<1x256xf32>
    %23 = arith.addf %22, %3 : vector<1x256xf32>
    %24 = vector.extract_strided_slice %23 {offsets = [0, 0], sizes = [1, 192], strides = [1, 1]} : vector<1x256xf32> to vector<1x192xf32>
    %25 = arith.negf %24 : vector<1x192xf32>
    %26 = math.exp %25 : vector<1x192xf32>
    %cst_15 = arith.constant 1.000000e+00 : f32
    %27 = vector.broadcast %cst_15 : f32 to vector<1x192xf32>
    %28 = arith.addf %27, %26 : vector<1x192xf32>
    %29 = arith.divf %27, %28 : vector<1x192xf32>
    %30 = vector.extract_strided_slice %23 {offsets = [0, 192], sizes = [1, 64], strides = [1, 1]} : vector<1x256xf32> to vector<1x64xf32>
    %31 = math.tanh %30 : vector<1x64xf32>
    %32 = vector.extract_strided_slice %29 {offsets = [0, 0], sizes = [1, 64], strides = [1, 1]} : vector<1x192xf32> to vector<1x64xf32>
    %33 = vector.extract_strided_slice %29 {offsets = [0, 128], sizes = [1, 64], strides = [1, 1]} : vector<1x192xf32> to vector<1x64xf32>
    %34 = arith.mulf %32, %31 : vector<1x64xf32>
    %35 = math.tanh %34 : vector<1x64xf32>
    %36 = arith.mulf %33, %35 : vector<1x64xf32>
    %c0_16 = arith.constant 0 : index
    %c0_17 = arith.constant 0 : index
    %37 = vector.load %arg10[%c0_16, %c0_17] : memref<8x64xf32, #tpu.memory_space<vmem>>, vector<1x64xf32>
    tpu.vector_store %arg10[%c0_16, %c0_17], %36 {strides = array<i32>} : memref<8x64xf32, #tpu.memory_space<vmem>>, vector<1x64xf32>,
    %cst_18 = arith.constant dense<0.000000e+00> : vector<1x256xf32>
    %38 = tpu.matmul %36, %2, %cst_18 {dimension_numbers = #tpu.dot_dimension_numbers<[1], [0], [0], [1], [0, 0, 1, 1], [], []>} : vector<1x64xf32>, vector<64x256xf32>, vector<1x256xf32> -> vector<1x256xf32>
    %39 = arith.addf %38, %3 : vector<1x256xf32>
    %cst_19 = arith.constant dense<0.000000e+00> : vector<1x128xf32>
    %40 = tpu.matmul %21, %0, %cst_19 {dimension_numbers = #tpu.dot_dimension_numbers<[1], [0], [0], [1], [0, 0, 1, 1], [], []>} : vector<1x32xf32>, vector<32x128xf32>, vector<1x128xf32> -> vector<1x128xf32>
    %41 = arith.addf %8, %40 : vector<1x128xf32>
    %42 = vector.extract_strided_slice %41 {offsets = [0, 0], sizes = [1, 96], strides = [1, 1]} : vector<1x128xf32> to vector<1x96xf32>
    %43 = arith.negf %42 : vector<1x96xf32>
    %44 = math.exp %43 : vector<1x96xf32>
    %cst_20 = arith.constant 1.000000e+00 : f32
    %45 = vector.broadcast %cst_20 : f32 to vector<1x96xf32>
    %46 = arith.addf %45, %44 : vector<1x96xf32>
    %47 = arith.divf %45, %46 : vector<1x96xf32>
    %48 = vector.extract_strided_slice %41 {offsets = [0, 96], sizes = [1, 32], strides = [1, 1]} : vector<1x128xf32> to vector<1x32xf32>
    %49 = math.tanh %48 : vector<1x32xf32>
    %50 = vector.extract_strided_slice %47 {offsets = [0, 0], sizes = [1, 32], strides = [1, 1]} : vector<1x96xf32> to vector<1x32xf32>
    %51 = vector.extract_strided_slice %47 {offsets = [0, 32], sizes = [1, 32], strides = [1, 1]} : vector<1x96xf32> to vector<1x32xf32>
    %52 = vector.extract_strided_slice %47 {offsets = [0, 64], sizes = [1, 32], strides = [1, 1]} : vector<1x96xf32> to vector<1x32xf32>
    %53 = arith.mulf %51, %19 : vector<1x32xf32>
    %54 = arith.mulf %50, %49 : vector<1x32xf32>
    %55 = arith.addf %53, %54 : vector<1x32xf32>
    %56 = math.tanh %55 : vector<1x32xf32>
    %57 = arith.mulf %52, %56 : vector<1x32xf32>
    %cst_21 = arith.constant dense<0.000000e+00> : vector<1x256xf32>
    %58 = tpu.matmul %57, %1, %cst_21 {dimension_numbers = #tpu.dot_dimension_numbers<[1], [0], [0], [1], [0, 0, 1, 1], [], []>} : vector<1x32xf32>, vector<32x256xf32>, vector<1x256xf32> -> vector<1x256xf32>
    %59 = arith.addf %39, %58 : vector<1x256xf32>
    %60 = vector.extract_strided_slice %59 {offsets = [0, 0], sizes = [1, 192], strides = [1, 1]} : vector<1x256xf32> to vector<1x192xf32>
    %61 = arith.negf %60 : vector<1x192xf32>
    %62 = math.exp %61 : vector<1x192xf32>
    %cst_22 = arith.constant 1.000000e+00 : f32
    %63 = vector.broadcast %cst_22 : f32 to vector<1x192xf32>
    %64 = arith.addf %63, %62 : vector<1x192xf32>
    %65 = arith.divf %63, %64 : vector<1x192xf32>
    %66 = vector.extract_strided_slice %59 {offsets = [0, 192], sizes = [1, 64], strides = [1, 1]} : vector<1x256xf32> to vector<1x64xf32>
    %67 = math.tanh %66 : vector<1x64xf32>
    %68 = vector.extract_strided_slice %65 {offsets = [0, 0], sizes = [1, 64], strides = [1, 1]} : vector<1x192xf32> to vector<1x64xf32>
    %69 = vector.extract_strided_slice %65 {offsets = [0, 64], sizes = [1, 64], strides = [1, 1]} : vector<1x192xf32> to vector<1x64xf32>
    %70 = vector.extract_strided_slice %65 {offsets = [0, 128], sizes = [1, 64], strides = [1, 1]} : vector<1x192xf32> to vector<1x64xf32>
    %71 = arith.mulf %69, %34 : vector<1x64xf32>
    %72 = arith.mulf %68, %67 : vector<1x64xf32>
    %73 = arith.addf %71, %72 : vector<1x64xf32>
    %74 = math.tanh %73 : vector<1x64xf32>
    %75 = arith.mulf %70, %74 : vector<1x64xf32>
    %c1 = arith.constant 1 : index
    %c0_23 = arith.constant 0 : index
    %76 = vector.load %arg10[%c1, %c0_23] : memref<8x64xf32, #tpu.memory_space<vmem>>, vector<1x64xf32>
    tpu.vector_store %arg10[%c1, %c0_23], %75 {strides = array<i32>} : memref<8x64xf32, #tpu.memory_space<vmem>>, vector<1x64xf32>,
    %cst_24 = arith.constant dense<0.000000e+00> : vector<1x256xf32>
    %77 = tpu.matmul %75, %2, %cst_24 {dimension_numbers = #tpu.dot_dimension_numbers<[1], [0], [0], [1], [0, 0, 1, 1], [], []>} : vector<1x64xf32>, vector<64x256xf32>, vector<1x256xf32> -> vector<1x256xf32>
    %78 = arith.addf %77, %3 : vector<1x256xf32>
    %cst_25 = arith.constant dense<0.000000e+00> : vector<1x128xf32>
    %79 = tpu.matmul %57, %0, %cst_25 {dimension_numbers = #tpu.dot_dimension_numbers<[1], [0], [0], [1], [0, 0, 1, 1], [], []>} : vector<1x32xf32>, vector<32x128xf32>, vector<1x128xf32> -> vector<1x128xf32>
    %80 = arith.addf %8, %79 : vector<1x128xf32>
    %81 = vector.extract_strided_slice %80 {offsets = [0, 0], sizes = [1, 96], strides = [1, 1]} : vector<1x128xf32> to vector<1x96xf32>
    %82 = arith.negf %81 : vector<1x96xf32>
    %83 = math.exp %82 : vector<1x96xf32>
    %cst_26 = arith.constant 1.000000e+00 : f32
    %84 = vector.broadcast %cst_26 : f32 to vector<1x96xf32>
    %85 = arith.addf %84, %83 : vector<1x96xf32>
    %86 = arith.divf %84, %85 : vector<1x96xf32>
    %87 = vector.extract_strided_slice %80 {offsets = [0, 96], sizes = [1, 32], strides = [1, 1]} : vector<1x128xf32> to vector<1x32xf32>
    %88 = math.tanh %87 : vector<1x32xf32>
    %89 = vector.extract_strided_slice %86 {offsets = [0, 0], sizes = [1, 32], strides = [1, 1]} : vector<1x96xf32> to vector<1x32xf32>
    %90 = vector.extract_strided_slice %86 {offsets = [0, 32], sizes = [1, 32], strides = [1, 1]} : vector<1x96xf32> to vector<1x32xf32>
    %91 = vector.extract_strided_slice %86 {offsets = [0, 64], sizes = [1, 32], strides = [1, 1]} : vector<1x96xf32> to vector<1x32xf32>
    %92 = arith.mulf %90, %55 : vector<1x32xf32>
    %93 = arith.mulf %89, %88 : vector<1x32xf32>
    %94 = arith.addf %92, %93 : vector<1x32xf32>
    %95 = math.tanh %94 : vector<1x32xf32>
    %96 = arith.mulf %91, %95 : vector<1x32xf32>
    %cst_27 = arith.constant dense<0.000000e+00> : vector<1x256xf32>
    %97 = tpu.matmul %96, %1, %cst_27 {dimension_numbers = #tpu.dot_dimension_numbers<[1], [0], [0], [1], [0, 0, 1, 1], [], []>} : vector<1x32xf32>, vector<32x256xf32>, vector<1x256xf32> -> vector<1x256xf32>
    %98 = arith.addf %78, %97 : vector<1x256xf32>
    %99 = vector.extract_strided_slice %98 {offsets = [0, 0], sizes = [1, 192], strides = [1, 1]} : vector<1x256xf32> to vector<1x192xf32>
    %100 = arith.negf %99 : vector<1x192xf32>
    %101 = math.exp %100 : vector<1x192xf32>
    %cst_28 = arith.constant 1.000000e+00 : f32
    %102 = vector.broadcast %cst_28 : f32 to vector<1x192xf32>
    %103 = arith.addf %102, %101 : vector<1x192xf32>
    %104 = arith.divf %102, %103 : vector<1x192xf32>
    %105 = vector.extract_strided_slice %98 {offsets = [0, 192], sizes = [1, 64], strides = [1, 1]} : vector<1x256xf32> to vector<1x64xf32>
    %106 = math.tanh %105 : vector<1x64xf32>
    %107 = vector.extract_strided_slice %104 {offsets = [0, 0], sizes = [1, 64], strides = [1, 1]} : vector<1x192xf32> to vector<1x64xf32>
    %108 = vector.extract_strided_slice %104 {offsets = [0, 64], sizes = [1, 64], strides = [1, 1]} : vector<1x192xf32> to vector<1x64xf32>
    %109 = vector.extract_strided_slice %104 {offsets = [0, 128], sizes = [1, 64], strides = [1, 1]} : vector<1x192xf32> to vector<1x64xf32>
    %110 = arith.mulf %108, %73 : vector<1x64xf32>
    %111 = arith.mulf %107, %106 : vector<1x64xf32>
    %112 = arith.addf %110, %111 : vector<1x64xf32>
    %113 = math.tanh %112 : vector<1x64xf32>
    %114 = arith.mulf %109, %113 : vector<1x64xf32>
    %c2 = arith.constant 2 : index
    %c0_29 = arith.constant 0 : index
    %115 = vector.load %arg10[%c2, %c0_29] : memref<8x64xf32, #tpu.memory_space<vmem>>, vector<1x64xf32>
    tpu.vector_store %arg10[%c2, %c0_29], %114 {strides = array<i32>} : memref<8x64xf32, #tpu.memory_space<vmem>>, vector<1x64xf32>,
    %cst_30 = arith.constant dense<0.000000e+00> : vector<1x256xf32>
    %116 = tpu.matmul %114, %2, %cst_30 {dimension_numbers = #tpu.dot_dimension_numbers<[1], [0], [0], [1], [0, 0, 1, 1], [], []>} : vector<1x64xf32>, vector<64x256xf32>, vector<1x256xf32> -> vector<1x256xf32>
    %117 = arith.addf %116, %3 : vector<1x256xf32>
    %cst_31 = arith.constant dense<0.000000e+00> : vector<1x128xf32>
    %118 = tpu.matmul %96, %0, %cst_31 {dimension_numbers = #tpu.dot_dimension_numbers<[1], [0], [0], [1], [0, 0, 1, 1], [], []>} : vector<1x32xf32>, vector<32x128xf32>, vector<1x128xf32> -> vector<1x128xf32>
    %119 = arith.addf %8, %118 : vector<1x128xf32>
    %120 = vector.extract_strided_slice %119 {offsets = [0, 0], sizes = [1, 96], strides = [1, 1]} : vector<1x128xf32> to vector<1x96xf32>
    %121 = arith.negf %120 : vector<1x96xf32>
    %122 = math.exp %121 : vector<1x96xf32>
    %cst_32 = arith.constant 1.000000e+00 : f32
    %123 = vector.broadcast %cst_32 : f32 to vector<1x96xf32>
    %124 = arith.addf %123, %122 : vector<1x96xf32>
    %125 = arith.divf %123, %124 : vector<1x96xf32>
    %126 = vector.extract_strided_slice %119 {offsets = [0, 96], sizes = [1, 32], strides = [1, 1]} : vector<1x128xf32> to vector<1x32xf32>
    %127 = math.tanh %126 : vector<1x32xf32>
    %128 = vector.extract_strided_slice %125 {offsets = [0, 0], sizes = [1, 32], strides = [1, 1]} : vector<1x96xf32> to vector<1x32xf32>
    %129 = vector.extract_strided_slice %125 {offsets = [0, 32], sizes = [1, 32], strides = [1, 1]} : vector<1x96xf32> to vector<1x32xf32>
    %130 = vector.extract_strided_slice %125 {offsets = [0, 64], sizes = [1, 32], strides = [1, 1]} : vector<1x96xf32> to vector<1x32xf32>
    %131 = arith.mulf %129, %94 : vector<1x32xf32>
    %132 = arith.mulf %128, %127 : vector<1x32xf32>
    %133 = arith.addf %131, %132 : vector<1x32xf32>
    %134 = math.tanh %133 : vector<1x32xf32>
    %135 = arith.mulf %130, %134 : vector<1x32xf32>
    %cst_33 = arith.constant dense<0.000000e+00> : vector<1x256xf32>
    %136 = tpu.matmul %135, %1, %cst_33 {dimension_numbers = #tpu.dot_dimension_numbers<[1], [0], [0], [1], [0, 0, 1, 1], [], []>} : vector<1x32xf32>, vector<32x256xf32>, vector<1x256xf32> -> vector<1x256xf32>
    %137 = arith.addf %117, %136 : vector<1x256xf32>
    %138 = vector.extract_strided_slice %137 {offsets = [0, 0], sizes = [1, 192], strides = [1, 1]} : vector<1x256xf32> to vector<1x192xf32>
    %139 = arith.negf %138 : vector<1x192xf32>
    %140 = math.exp %139 : vector<1x192xf32>
    %cst_34 = arith.constant 1.000000e+00 : f32
    %141 = vector.broadcast %cst_34 : f32 to vector<1x192xf32>
    %142 = arith.addf %141, %140 : vector<1x192xf32>
    %143 = arith.divf %141, %142 : vector<1x192xf32>
    %144 = vector.extract_strided_slice %137 {offsets = [0, 192], sizes = [1, 64], strides = [1, 1]} : vector<1x256xf32> to vector<1x64xf32>
    %145 = math.tanh %144 : vector<1x64xf32>
    %146 = vector.extract_strided_slice %143 {offsets = [0, 0], sizes = [1, 64], strides = [1, 1]} : vector<1x192xf32> to vector<1x64xf32>
    %147 = vector.extract_strided_slice %143 {offsets = [0, 64], sizes = [1, 64], strides = [1, 1]} : vector<1x192xf32> to vector<1x64xf32>
    %148 = vector.extract_strided_slice %143 {offsets = [0, 128], sizes = [1, 64], strides = [1, 1]} : vector<1x192xf32> to vector<1x64xf32>
    %149 = arith.mulf %147, %112 : vector<1x64xf32>
    %150 = arith.mulf %146, %145 : vector<1x64xf32>
    %151 = arith.addf %149, %150 : vector<1x64xf32>
    %152 = math.tanh %151 : vector<1x64xf32>
    %153 = arith.mulf %148, %152 : vector<1x64xf32>
    %c3 = arith.constant 3 : index
    %c0_35 = arith.constant 0 : index
    %154 = vector.load %arg10[%c3, %c0_35] : memref<8x64xf32, #tpu.memory_space<vmem>>, vector<1x64xf32>
    tpu.vector_store %arg10[%c3, %c0_35], %153 {strides = array<i32>} : memref<8x64xf32, #tpu.memory_space<vmem>>, vector<1x64xf32>,
    %cst_36 = arith.constant dense<0.000000e+00> : vector<1x256xf32>
    %155 = tpu.matmul %153, %2, %cst_36 {dimension_numbers = #tpu.dot_dimension_numbers<[1], [0], [0], [1], [0, 0, 1, 1], [], []>} : vector<1x64xf32>, vector<64x256xf32>, vector<1x256xf32> -> vector<1x256xf32>
    %156 = arith.addf %155, %3 : vector<1x256xf32>
    %cst_37 = arith.constant dense<0.000000e+00> : vector<1x128xf32>
    %157 = tpu.matmul %135, %0, %cst_37 {dimension_numbers = #tpu.dot_dimension_numbers<[1], [0], [0], [1], [0, 0, 1, 1], [], []>} : vector<1x32xf32>, vector<32x128xf32>, vector<1x128xf32> -> vector<1x128xf32>
    %158 = arith.addf %8, %157 : vector<1x128xf32>
    %159 = vector.extract_strided_slice %158 {offsets = [0, 0], sizes = [1, 96], strides = [1, 1]} : vector<1x128xf32> to vector<1x96xf32>
    %160 = arith.negf %159 : vector<1x96xf32>
    %161 = math.exp %160 : vector<1x96xf32>
    %cst_38 = arith.constant 1.000000e+00 : f32
    %162 = vector.broadcast %cst_38 : f32 to vector<1x96xf32>
    %163 = arith.addf %162, %161 : vector<1x96xf32>
    %164 = arith.divf %162, %163 : vector<1x96xf32>
    %165 = vector.extract_strided_slice %158 {offsets = [0, 96], sizes = [1, 32], strides = [1, 1]} : vector<1x128xf32> to vector<1x32xf32>
    %166 = math.tanh %165 : vector<1x32xf32>
    %167 = vector.extract_strided_slice %164 {offsets = [0, 0], sizes = [1, 32], strides = [1, 1]} : vector<1x96xf32> to vector<1x32xf32>
    %168 = vector.extract_strided_slice %164 {offsets = [0, 32], sizes = [1, 32], strides = [1, 1]} : vector<1x96xf32> to vector<1x32xf32>
    %169 = vector.extract_strided_slice %164 {offsets = [0, 64], sizes = [1, 32], strides = [1, 1]} : vector<1x96xf32> to vector<1x32xf32>
    %170 = arith.mulf %168, %133 : vector<1x32xf32>
    %171 = arith.mulf %167, %166 : vector<1x32xf32>
    %172 = arith.addf %170, %171 : vector<1x32xf32>
    %173 = math.tanh %172 : vector<1x32xf32>
    %174 = arith.mulf %169, %173 : vector<1x32xf32>
    %cst_39 = arith.constant dense<0.000000e+00> : vector<1x256xf32>
    %175 = tpu.matmul %174, %1, %cst_39 {dimension_numbers = #tpu.dot_dimension_numbers<[1], [0], [0], [1], [0, 0, 1, 1], [], []>} : vector<1x32xf32>, vector<32x256xf32>, vector<1x256xf32> -> vector<1x256xf32>
    %176 = arith.addf %156, %175 : vector<1x256xf32>
    %177 = vector.extract_strided_slice %176 {offsets = [0, 0], sizes = [1, 192], strides = [1, 1]} : vector<1x256xf32> to vector<1x192xf32>
    %178 = arith.negf %177 : vector<1x192xf32>
    %179 = math.exp %178 : vector<1x192xf32>
    %cst_40 = arith.constant 1.000000e+00 : f32
    %180 = vector.broadcast %cst_40 : f32 to vector<1x192xf32>
    %181 = arith.addf %180, %179 : vector<1x192xf32>
    %182 = arith.divf %180, %181 : vector<1x192xf32>
    %183 = vector.extract_strided_slice %176 {offsets = [0, 192], sizes = [1, 64], strides = [1, 1]} : vector<1x256xf32> to vector<1x64xf32>
    %184 = math.tanh %183 : vector<1x64xf32>
    %185 = vector.extract_strided_slice %182 {offsets = [0, 0], sizes = [1, 64], strides = [1, 1]} : vector<1x192xf32> to vector<1x64xf32>
    %186 = vector.extract_strided_slice %182 {offsets = [0, 64], sizes = [1, 64], strides = [1, 1]} : vector<1x192xf32> to vector<1x64xf32>
    %187 = vector.extract_strided_slice %182 {offsets = [0, 128], sizes = [1, 64], strides = [1, 1]} : vector<1x192xf32> to vector<1x64xf32>
    %188 = arith.mulf %186, %151 : vector<1x64xf32>
    %189 = arith.mulf %185, %184 : vector<1x64xf32>
    %190 = arith.addf %188, %189 : vector<1x64xf32>
    %191 = math.tanh %190 : vector<1x64xf32>
    %192 = arith.mulf %187, %191 : vector<1x64xf32>
    %c4 = arith.constant 4 : index
    %c0_41 = arith.constant 0 : index
    %193 = vector.load %arg10[%c4, %c0_41] : memref<8x64xf32, #tpu.memory_space<vmem>>, vector<1x64xf32>
    tpu.vector_store %arg10[%c4, %c0_41], %192 {strides = array<i32>} : memref<8x64xf32, #tpu.memory_space<vmem>>, vector<1x64xf32>,
    %cst_42 = arith.constant dense<0.000000e+00> : vector<1x256xf32>
    %194 = tpu.matmul %192, %2, %cst_42 {dimension_numbers = #tpu.dot_dimension_numbers<[1], [0], [0], [1], [0, 0, 1, 1], [], []>} : vector<1x64xf32>, vector<64x256xf32>, vector<1x256xf32> -> vector<1x256xf32>
    %195 = arith.addf %194, %3 : vector<1x256xf32>
    %cst_43 = arith.constant dense<0.000000e+00> : vector<1x128xf32>
    %196 = tpu.matmul %174, %0, %cst_43 {dimension_numbers = #tpu.dot_dimension_numbers<[1], [0], [0], [1], [0, 0, 1, 1], [], []>} : vector<1x32xf32>, vector<32x128xf32>, vector<1x128xf32> -> vector<1x128xf32>
    %197 = arith.addf %8, %196 : vector<1x128xf32>
    %198 = vector.extract_strided_slice %197 {offsets = [0, 0], sizes = [1, 96], strides = [1, 1]} : vector<1x128xf32> to vector<1x96xf32>
    %199 = arith.negf %198 : vector<1x96xf32>
    %200 = math.exp %199 : vector<1x96xf32>
    %cst_44 = arith.constant 1.000000e+00 : f32
    %201 = vector.broadcast %cst_44 : f32 to vector<1x96xf32>
    %202 = arith.addf %201, %200 : vector<1x96xf32>
    %203 = arith.divf %201, %202 : vector<1x96xf32>
    %204 = vector.extract_strided_slice %197 {offsets = [0, 96], sizes = [1, 32], strides = [1, 1]} : vector<1x128xf32> to vector<1x32xf32>
    %205 = math.tanh %204 : vector<1x32xf32>
    %206 = vector.extract_strided_slice %203 {offsets = [0, 0], sizes = [1, 32], strides = [1, 1]} : vector<1x96xf32> to vector<1x32xf32>
    %207 = vector.extract_strided_slice %203 {offsets = [0, 32], sizes = [1, 32], strides = [1, 1]} : vector<1x96xf32> to vector<1x32xf32>
    %208 = vector.extract_strided_slice %203 {offsets = [0, 64], sizes = [1, 32], strides = [1, 1]} : vector<1x96xf32> to vector<1x32xf32>
    %209 = arith.mulf %207, %172 : vector<1x32xf32>
    %210 = arith.mulf %206, %205 : vector<1x32xf32>
    %211 = arith.addf %209, %210 : vector<1x32xf32>
    %212 = math.tanh %211 : vector<1x32xf32>
    %213 = arith.mulf %208, %212 : vector<1x32xf32>
    %cst_45 = arith.constant dense<0.000000e+00> : vector<1x256xf32>
    %214 = tpu.matmul %213, %1, %cst_45 {dimension_numbers = #tpu.dot_dimension_numbers<[1], [0], [0], [1], [0, 0, 1, 1], [], []>} : vector<1x32xf32>, vector<32x256xf32>, vector<1x256xf32> -> vector<1x256xf32>
    %215 = arith.addf %195, %214 : vector<1x256xf32>
    %216 = vector.extract_strided_slice %215 {offsets = [0, 0], sizes = [1, 192], strides = [1, 1]} : vector<1x256xf32> to vector<1x192xf32>
    %217 = arith.negf %216 : vector<1x192xf32>
    %218 = math.exp %217 : vector<1x192xf32>
    %cst_46 = arith.constant 1.000000e+00 : f32
    %219 = vector.broadcast %cst_46 : f32 to vector<1x192xf32>
    %220 = arith.addf %219, %218 : vector<1x192xf32>
    %221 = arith.divf %219, %220 : vector<1x192xf32>
    %222 = vector.extract_strided_slice %215 {offsets = [0, 192], sizes = [1, 64], strides = [1, 1]} : vector<1x256xf32> to vector<1x64xf32>
    %223 = math.tanh %222 : vector<1x64xf32>
    %224 = vector.extract_strided_slice %221 {offsets = [0, 0], sizes = [1, 64], strides = [1, 1]} : vector<1x192xf32> to vector<1x64xf32>
    %225 = vector.extract_strided_slice %221 {offsets = [0, 64], sizes = [1, 64], strides = [1, 1]} : vector<1x192xf32> to vector<1x64xf32>
    %226 = vector.extract_strided_slice %221 {offsets = [0, 128], sizes = [1, 64], strides = [1, 1]} : vector<1x192xf32> to vector<1x64xf32>
    %227 = arith.mulf %225, %190 : vector<1x64xf32>
    %228 = arith.mulf %224, %223 : vector<1x64xf32>
    %229 = arith.addf %227, %228 : vector<1x64xf32>
    %230 = math.tanh %229 : vector<1x64xf32>
    %231 = arith.mulf %226, %230 : vector<1x64xf32>
    %c5 = arith.constant 5 : index
    %c0_47 = arith.constant 0 : index
    %232 = vector.load %arg10[%c5, %c0_47] : memref<8x64xf32, #tpu.memory_space<vmem>>, vector<1x64xf32>
    tpu.vector_store %arg10[%c5, %c0_47], %231 {strides = array<i32>} : memref<8x64xf32, #tpu.memory_space<vmem>>, vector<1x64xf32>,
    %cst_48 = arith.constant dense<0.000000e+00> : vector<1x256xf32>
    %233 = tpu.matmul %231, %2, %cst_48 {dimension_numbers = #tpu.dot_dimension_numbers<[1], [0], [0], [1], [0, 0, 1, 1], [], []>} : vector<1x64xf32>, vector<64x256xf32>, vector<1x256xf32> -> vector<1x256xf32>
    %234 = arith.addf %233, %3 : vector<1x256xf32>
    %cst_49 = arith.constant dense<0.000000e+00> : vector<1x128xf32>
    %235 = tpu.matmul %213, %0, %cst_49 {dimension_numbers = #tpu.dot_dimension_numbers<[1], [0], [0], [1], [0, 0, 1, 1], [], []>} : vector<1x32xf32>, vector<32x128xf32>, vector<1x128xf32> -> vector<1x128xf32>
    %236 = arith.addf %8, %235 : vector<1x128xf32>
    %237 = vector.extract_strided_slice %236 {offsets = [0, 0], sizes = [1, 96], strides = [1, 1]} : vector<1x128xf32> to vector<1x96xf32>
    %238 = arith.negf %237 : vector<1x96xf32>
    %239 = math.exp %238 : vector<1x96xf32>
    %cst_50 = arith.constant 1.000000e+00 : f32
    %240 = vector.broadcast %cst_50 : f32 to vector<1x96xf32>
    %241 = arith.addf %240, %239 : vector<1x96xf32>
    %242 = arith.divf %240, %241 : vector<1x96xf32>
    %243 = vector.extract_strided_slice %236 {offsets = [0, 96], sizes = [1, 32], strides = [1, 1]} : vector<1x128xf32> to vector<1x32xf32>
    %244 = math.tanh %243 : vector<1x32xf32>
    %245 = vector.extract_strided_slice %242 {offsets = [0, 0], sizes = [1, 32], strides = [1, 1]} : vector<1x96xf32> to vector<1x32xf32>
    %246 = vector.extract_strided_slice %242 {offsets = [0, 32], sizes = [1, 32], strides = [1, 1]} : vector<1x96xf32> to vector<1x32xf32>
    %247 = vector.extract_strided_slice %242 {offsets = [0, 64], sizes = [1, 32], strides = [1, 1]} : vector<1x96xf32> to vector<1x32xf32>
    %248 = arith.mulf %246, %211 : vector<1x32xf32>
    %249 = arith.mulf %245, %244 : vector<1x32xf32>
    %250 = arith.addf %248, %249 : vector<1x32xf32>
    %251 = math.tanh %250 : vector<1x32xf32>
    %252 = arith.mulf %247, %251 : vector<1x32xf32>
    %cst_51 = arith.constant dense<0.000000e+00> : vector<1x256xf32>
    %253 = tpu.matmul %252, %1, %cst_51 {dimension_numbers = #tpu.dot_dimension_numbers<[1], [0], [0], [1], [0, 0, 1, 1], [], []>} : vector<1x32xf32>, vector<32x256xf32>, vector<1x256xf32> -> vector<1x256xf32>
    %254 = arith.addf %234, %253 : vector<1x256xf32>
    %255 = vector.extract_strided_slice %254 {offsets = [0, 0], sizes = [1, 192], strides = [1, 1]} : vector<1x256xf32> to vector<1x192xf32>
    %256 = arith.negf %255 : vector<1x192xf32>
    %257 = math.exp %256 : vector<1x192xf32>
    %cst_52 = arith.constant 1.000000e+00 : f32
    %258 = vector.broadcast %cst_52 : f32 to vector<1x192xf32>
    %259 = arith.addf %258, %257 : vector<1x192xf32>
    %260 = arith.divf %258, %259 : vector<1x192xf32>
    %261 = vector.extract_strided_slice %254 {offsets = [0, 192], sizes = [1, 64], strides = [1, 1]} : vector<1x256xf32> to vector<1x64xf32>
    %262 = math.tanh %261 : vector<1x64xf32>
    %263 = vector.extract_strided_slice %260 {offsets = [0, 0], sizes = [1, 64], strides = [1, 1]} : vector<1x192xf32> to vector<1x64xf32>
    %264 = vector.extract_strided_slice %260 {offsets = [0, 64], sizes = [1, 64], strides = [1, 1]} : vector<1x192xf32> to vector<1x64xf32>
    %265 = vector.extract_strided_slice %260 {offsets = [0, 128], sizes = [1, 64], strides = [1, 1]} : vector<1x192xf32> to vector<1x64xf32>
    %266 = arith.mulf %264, %229 : vector<1x64xf32>
    %267 = arith.mulf %263, %262 : vector<1x64xf32>
    %268 = arith.addf %266, %267 : vector<1x64xf32>
    %269 = math.tanh %268 : vector<1x64xf32>
    %270 = arith.mulf %265, %269 : vector<1x64xf32>
    %c6 = arith.constant 6 : index
    %c0_53 = arith.constant 0 : index
    %271 = vector.load %arg10[%c6, %c0_53] : memref<8x64xf32, #tpu.memory_space<vmem>>, vector<1x64xf32>
    tpu.vector_store %arg10[%c6, %c0_53], %270 {strides = array<i32>} : memref<8x64xf32, #tpu.memory_space<vmem>>, vector<1x64xf32>,
    %cst_54 = arith.constant dense<0.000000e+00> : vector<1x256xf32>
    %272 = tpu.matmul %270, %2, %cst_54 {dimension_numbers = #tpu.dot_dimension_numbers<[1], [0], [0], [1], [0, 0, 1, 1], [], []>} : vector<1x64xf32>, vector<64x256xf32>, vector<1x256xf32> -> vector<1x256xf32>
    %273 = arith.addf %272, %3 : vector<1x256xf32>
    %cst_55 = arith.constant dense<0.000000e+00> : vector<1x128xf32>
    %274 = tpu.matmul %252, %0, %cst_55 {dimension_numbers = #tpu.dot_dimension_numbers<[1], [0], [0], [1], [0, 0, 1, 1], [], []>} : vector<1x32xf32>, vector<32x128xf32>, vector<1x128xf32> -> vector<1x128xf32>
    %275 = arith.addf %8, %274 : vector<1x128xf32>
    %276 = vector.extract_strided_slice %275 {offsets = [0, 0], sizes = [1, 96], strides = [1, 1]} : vector<1x128xf32> to vector<1x96xf32>
    %277 = arith.negf %276 : vector<1x96xf32>
    %278 = math.exp %277 : vector<1x96xf32>
    %cst_56 = arith.constant 1.000000e+00 : f32
    %279 = vector.broadcast %cst_56 : f32 to vector<1x96xf32>
    %280 = arith.addf %279, %278 : vector<1x96xf32>
    %281 = arith.divf %279, %280 : vector<1x96xf32>
    %282 = vector.extract_strided_slice %275 {offsets = [0, 96], sizes = [1, 32], strides = [1, 1]} : vector<1x128xf32> to vector<1x32xf32>
    %283 = math.tanh %282 : vector<1x32xf32>
    %284 = vector.extract_strided_slice %281 {offsets = [0, 0], sizes = [1, 32], strides = [1, 1]} : vector<1x96xf32> to vector<1x32xf32>
    %285 = vector.extract_strided_slice %281 {offsets = [0, 32], sizes = [1, 32], strides = [1, 1]} : vector<1x96xf32> to vector<1x32xf32>
    %286 = vector.extract_strided_slice %281 {offsets = [0, 64], sizes = [1, 32], strides = [1, 1]} : vector<1x96xf32> to vector<1x32xf32>
    %287 = arith.mulf %285, %250 : vector<1x32xf32>
    %288 = arith.mulf %284, %283 : vector<1x32xf32>
    %289 = arith.addf %287, %288 : vector<1x32xf32>
    %290 = math.tanh %289 : vector<1x32xf32>
    %291 = arith.mulf %286, %290 : vector<1x32xf32>
    %cst_57 = arith.constant dense<0.000000e+00> : vector<1x256xf32>
    %292 = tpu.matmul %291, %1, %cst_57 {dimension_numbers = #tpu.dot_dimension_numbers<[1], [0], [0], [1], [0, 0, 1, 1], [], []>} : vector<1x32xf32>, vector<32x256xf32>, vector<1x256xf32> -> vector<1x256xf32>
    %293 = arith.addf %273, %292 : vector<1x256xf32>
    %294 = vector.extract_strided_slice %293 {offsets = [0, 0], sizes = [1, 192], strides = [1, 1]} : vector<1x256xf32> to vector<1x192xf32>
    %295 = arith.negf %294 : vector<1x192xf32>
    %296 = math.exp %295 : vector<1x192xf32>
    %cst_58 = arith.constant 1.000000e+00 : f32
    %297 = vector.broadcast %cst_58 : f32 to vector<1x192xf32>
    %298 = arith.addf %297, %296 : vector<1x192xf32>
    %299 = arith.divf %297, %298 : vector<1x192xf32>
    %300 = vector.extract_strided_slice %293 {offsets = [0, 192], sizes = [1, 64], strides = [1, 1]} : vector<1x256xf32> to vector<1x64xf32>
    %301 = math.tanh %300 : vector<1x64xf32>
    %302 = vector.extract_strided_slice %299 {offsets = [0, 0], sizes = [1, 64], strides = [1, 1]} : vector<1x192xf32> to vector<1x64xf32>
    %303 = vector.extract_strided_slice %299 {offsets = [0, 64], sizes = [1, 64], strides = [1, 1]} : vector<1x192xf32> to vector<1x64xf32>
    %304 = vector.extract_strided_slice %299 {offsets = [0, 128], sizes = [1, 64], strides = [1, 1]} : vector<1x192xf32> to vector<1x64xf32>
    %305 = arith.mulf %303, %268 : vector<1x64xf32>
    %306 = arith.mulf %302, %301 : vector<1x64xf32>
    %307 = arith.addf %305, %306 : vector<1x64xf32>
    %308 = math.tanh %307 : vector<1x64xf32>
    %309 = arith.mulf %304, %308 : vector<1x64xf32>
    %c7 = arith.constant 7 : index
    %c0_59 = arith.constant 0 : index
    %310 = vector.load %arg10[%c7, %c0_59] : memref<8x64xf32, #tpu.memory_space<vmem>>, vector<1x64xf32>
    tpu.vector_store %arg10[%c7, %c0_59], %309 {strides = array<i32>} : memref<8x64xf32, #tpu.memory_space<vmem>>, vector<1x64xf32>,
    %c0_60 = arith.constant 0 : index
    %c0_61 = arith.constant 0 : index
    %311 = vector.load %arg10[%c0_60, %c0_61] : memref<8x64xf32, #tpu.memory_space<vmem>>, vector<8x64xf32>
    %c0_62 = arith.constant 0 : index
    %c0_63 = arith.constant 0 : index
    %312 = vector.load %arg7[%c0_62, %c0_63] : memref<64x1xf32, #tpu.memory_space<vmem>>, vector<64x1xf32>
    %cst_64 = arith.constant dense<0.000000e+00> : vector<8x1xf32>
    %313 = tpu.matmul %311, %312, %cst_64 {dimension_numbers = #tpu.dot_dimension_numbers<[1], [0], [0], [1], [0, 0, 1, 1], [], []>} : vector<8x64xf32>, vector<64x1xf32>, vector<8x1xf32> -> vector<8x1xf32>
    %c0_65 = arith.constant 0 : index
    %c0_66 = arith.constant 0 : index
    %314 = vector.load %arg8[%c0_65, %c0_66] : memref<1x1xf32, #tpu.memory_space<vmem>>, vector<1x1xf32>
    %315 = vector.broadcast %314 : vector<1x1xf32> to vector<8x1xf32>
    %316 = arith.addf %313, %315 : vector<8x1xf32>
    %c0_67 = arith.constant 0 : index
    %c0_68 = arith.constant 0 : index
    %317 = vector.load %arg9[%c0_67, %c0_68] : memref<8x1xf32, #tpu.memory_space<vmem>>, vector<8x1xf32>
    tpu.vector_store %arg9[%c0_67, %c0_68], %316 {strides = array<i32>} : memref<8x1xf32, #tpu.memory_space<vmem>>, vector<8x1xf32>,
    return
  }
}

</mosaic_0001>

<bundles_post_ra>
// kernel: tpu_custom_call.1
= control target key start
LH: loop header
LB: loop body
LE: loop exit
PB: predicated region body
PF: predicated region fallthrough
CT: control target
= control target key end

     0   :  { %s3590_s0 = inlined_call_operand.vmem [shape: f32[1,32], index: 0, kind: input, shape index: {}]   ;;  %s3591_s1 = inlined_call_operand.hbm [shape: f32[32,128], index: 1, kind: input, shape index: {}]   ;;  %s3592_s2 = inlined_call_operand.hbm [shape: f32[32,128], index: 2, kind: input, shape index: {}]   ;;  %s3593_s3 = inlined_call_operand.vmem [shape: f32[1,128], index: 3, kind: input, shape index: {}]   ;;  %s3594_s4 = inlined_call_operand.vmem [shape: f32[32,256], index: 4, kind: input, shape index: {}]   ;;  %s3595_s5 = inlined_call_operand.hbm [shape: f32[64,256], index: 5, kind: input, shape index: {}]   ;;  %s3596_s6 = inlined_call_operand.vmem [shape: f32[1,256], index: 6, kind: input, shape index: {}]   ;;  %s3597_s7 = inlined_call_operand.vmem [shape: f32[64,1], index: 7, kind: input, shape index: {}]   ;;  %s3598_s8 = inlined_call_operand.<no memory space> [shape: f32[1,1], index: 8, kind: input, shape index: {}]   ;;  %s3599_s9 = inlined_call_operand.vmem [shape: f32[8,1], index: 9, kind: output, shape index: {}]  }
   0x1   :  { %v14_v0 = vstv %s3598_s8 }
   0x2   :  { %15 = vst [vmem:[#allocation3] sm:$0x1] %v14_v0 }
   0x3   :  { %16 = vsyncpa [#allocation5], 0 }
   0x4   :  { %17 = vsyncpa [#allocation7], 0  ;;  %s3074_s11 = smov [#allocation6]   ;;  %s3075_s13 = smov [#allocation4]  }
   0x5   :  { %s37_s12 = sshll.u32 %s3074_s11, 4  ;;  %s25_s14 = sshll.u32 %s3075_s13, 4  ;;  %s38_s12 = int_to_ptr.vmem [resolvable:$true] %s37_s12  ;;  %s3139_s14 = int_to_ptr.vmem [resolvable:$true] %s25_s14 }
   0x6   :  { %s3004_s17 = scalar_lea.hbm %s3592_s2, 512 }
   0x7   :  { %p3005_p0 = scmp.ne.s32.totalorder %s3592_s2, %s3004_s17  ;;  %p3008_p1 = scmp.lt.u32.totalorder %s3004_s17, %s3592_s2 }
   0x9   :  { %p3010_p2 = pnand %p3008_p1, %p3005_p0 }
   0xb   :  { %3013 = shalt.err (!%p3010_p2)
}
   0xc   :  { %s3014_s21 = scalar_lea.vmem %s38_s12, 512  ;;  %p3019_p4 = scmp.lt.s32.totalorder %s38_s12, %s38_s12 }
   0xd   :  { %p3015_p3 = scmp.ne.s32.totalorder %s38_s12, %s3014_s21  ;;  %p3020_p5 = scmp.lt.s32.totalorder %s3014_s21, %s3014_s21 }
   0xf   :  { %p3021_p6 = por %p3020_p5, %p3019_p4 }
  0x11   :  { %p3022_p7 = pnand %p3021_p6, %p3015_p3 }
  0x13   :  { %3025 = shalt.err (!%p3022_p7)
}
  0x14   :  { %s3076_s22 = smov 128   ;;  %s3077_s23 = smov 8  }
  0x15   :  { %43 = dma.hbm_to_vmem [thread:$0]  %s3592_s2, 512, %s38_s12, [#allocation7], %s3076_s22, %s3076_s22, %s3077_s23  }
  0x16   :  { %s3026_s28 = scalar_lea.hbm %s3591_s1, 512 }
  0x17   :  { %p3027_p8 = scmp.ne.s32.totalorder %s3591_s1, %s3026_s28  ;;  %p3030_p9 = scmp.lt.u32.totalorder %s3026_s28, %s3591_s1 }
  0x19   :  { %p3032_p10 = pnand %p3030_p9, %p3027_p8 }
  0x1b   :  { %3035 = shalt.err (!%p3032_p10)
}
  0x1c   :  { %s3036_s13 = scalar_lea.vmem %s3139_s14, 512  ;;  %p3041_p12 = scmp.lt.s32.totalorder %s3139_s14, %s3139_s14 }
  0x1d   :  { %p3037_p11 = scmp.ne.s32.totalorder %s3139_s14, %s3036_s13  ;;  %p3042_p13 = scmp.lt.s32.totalorder %s3036_s13, %s3036_s13 }
  0x1f   :  { %p3043_p0 = por %p3042_p13, %p3041_p12 }
  0x21   :  { %p3044_p1 = pnand %p3043_p0, %p3037_p11 }
  0x23   :  { %3047 = shalt.err (!%p3044_p1)
}
  0x24   :  { %31 = dma.hbm_to_vmem [thread:$0]  %s3591_s1, 512, %s3139_s14, [#allocation5], %s3076_s22, %s3076_s22, %s3077_s23  }
  0x25   :  { %s3078_s15 = smov [#allocation8]   ;;  %s3048_s19 = scalar_lea.hbm %s3595_s5, 2048 }
  0x26   :  { %s53_s16 = sshll.u32 %s3078_s15, 4  ;;  %p3049_p2 = scmp.ne.s32.totalorder %s3595_s5, %s3048_s19  ;;  %s54_s16 = int_to_ptr.vmem [resolvable:$true] %s53_s16 }
  0x27   :  { %p3052_p3 = scmp.lt.u32.totalorder %s3048_s19, %s3595_s5 }
  0x29   :  { %p3054_p4 = pnand %p3052_p3, %p3049_p2 }
  0x2b   :  { %3057 = shalt.err (!%p3054_p4)
}
  0x2c   :  { %s3058_s25 = scalar_lea.vmem %s54_s16, 2048  ;;  %p3063_p6 = scmp.lt.s32.totalorder %s54_s16, %s54_s16 }
  0x2d   :  { %p3059_p5 = scmp.ne.s32.totalorder %s54_s16, %s3058_s25  ;;  %p3064_p7 = scmp.lt.s32.totalorder %s3058_s25, %s3058_s25 }
  0x2f   :  { %p3065_p8 = por %p3064_p7, %p3063_p6 }
  0x31   :  { %p3066_p9 = pnand %p3065_p8, %p3059_p5 }
  0x33   :  { %3069 = shalt.err (!%p3066_p9)
}
  0x34   :  { %s3079_s1 = smov 256   ;;  %s3080_s14 = smov 16  }
  0x35   :  { %59 = dma.hbm_to_vmem [thread:$0]  %s3595_s5, 2048, %s54_s16, [#allocation7], %s3079_s1, %s3079_s1, %s3080_s14  }
  0x36   :  { %3070 = dma.done.wait [#allocation5], 512  }
  0x37   :  { %3071 = vsyncadd [#allocation5], 4294966784 }
  0x38   :  { %3072 = dma.done.wait [#allocation7], 2560  }
  0x39   :  { %3073 = vsyncadd [#allocation7], 4294964736  ;;  %v3081_v1 = vmov 0.0|0.0   ;;  %vm3082_vm0 = vmmov 0   ;;  %v3083_v2 = vmov 0.0   ;;  %v105_v3 = vld [vmem:[#allocation4] sm:$0xff]  ;;  %v206_v50 = vlaneseq }
  0x3a   :  { %2568 = vmatprep.subr.bf16.mxu0 %v3081_v1  ;;  %2469 = vmatprep.mubr.msk.f32.mxu0 %vm3082_vm0, %v3083_v2  ;;  %v106_v4 = vld [vmem:[#allocation4 + $0x8] sm:$0xff]  ;;  %v107_v5 = vld [vmem:[#allocation4 + $0x10] sm:$0xff]  ;;  %v108_v7 = vld [vmem:[#allocation4 + $0x18] sm:$0xff]  ;;  %vm110_vm1 = vcmask 261120   ;;  %s3084_s29 = smov 32   ;;  %s3085_s24 = smov 64  }
  0x3b   :  { %282 = vmatprep.mubr.f32.mxu1 %v3083_v2  ;;  %v2569_v6 = vpack.c.bf16 %v106_v4, %v105_v3  ;;  %v2572_v8 = vpack.c.bf16 %v108_v7, %v107_v5  ;;  %v104_v9 = vld [vmem:[%s3590_s0] sm:$0x1]  ;;  %v80_v21 = vld [vmem:[%s3594_s4 + $0x8] sm:$0xff]  ;;  %v82_v22 = vld [vmem:[%s3594_s4 + $0x18] sm:$0xff]  ;;  %v207_v51 = vshrl.u32 %v206_v50, 7  ;;  %vm309_vm2 = vcmask 516096  }
  0x3c   :  { %v109_v10 = vld [vmem:[%s3593_s3] sm:$0x1]  ;;  %v3209_v24 = vpack.c.bf16 %v82_v22, %v80_v21  ;;  %v81_v25 = vld [vmem:[%s3594_s4 + $0x10] sm:$0xff]  ;;  %v84_v26 = vld [vmem:[%s3594_s4 + $0x28] sm:$0xff]  ;;  %vm311_vm3 = vcmask 523264   ;;  %vm2355_vm4 = vcmask 7168  }
  0x3d   :  { %2570 = vmatpush3.bf16.msra.mxu0 %v2569_v6  ;;  %v79_v23 = vld [vmem:[%s3594_s4] sm:$0xff]  ;;  %v86_v27 = vld [vmem:[%s3594_s4 + $0x38] sm:$0xff]  ;;  %v85_v31 = vld [vmem:[%s3594_s4 + $0x30] sm:$0xff]  ;;  %v212_v53 = vsub.s32 1, %v207_v51 }
  0x3e   :  { %2571 = vmatprep.subr.bf16.mxu0 %v3081_v1  ;;  %v3220_v28 = vpack.c.bf16 %v81_v25, %v79_v23  ;;  %v3222_v29 = vpack.c.bf16 %v86_v27, %v84_v26  ;;  %v83_v30 = vld [vmem:[%s3594_s4 + $0x20] sm:$0xff]  ;;  %2575 = vmatprep.subr.bf16.mxu1 %v3209_v24  ;;  %v75_v36 = vld [vmem:[#allocation6] sm:$0xff]  ;;  %v76_v37 = vld [vmem:[#allocation6 + $0x8] sm:$0xff]  ;;  %v208_v26 = vsub.s32 0, %v207_v51 }
  0x3f   :  { %v3232_v32 = vpack.c.bf16 %v85_v31, %v83_v30  ;;  %v3240_v38 = vpack.c.bf16 %v76_v37, %v75_v36  ;;  %v77_v39 = vld [vmem:[#allocation6 + $0x10] sm:$0xff]  ;;  %v78_v40 = vld [vmem:[#allocation6 + $0x18] sm:$0xff]  ;;  %v88_v57 = vld [vmem:[#allocation8 + $0x8] sm:$0xff] }
  0x40   :  { %2577 = vmatpush1.bf16.msra.mxu1 %v3220_v28  ;;  %v3244_v42 = vpack.c.bf16 %v78_v40, %v77_v39  ;;  %v103_v54 = vld [vmem:[%s3596_s6] sm:$0x3]  ;;  %v87_v60 = vld [vmem:[#allocation8] sm:$0xff]  ;;  %v92_v0 = vld [vmem:[#allocation8 + $0x28] sm:$0xff] }
  0x41   :  { %2573 = vmatpush3.bf16.msra.mxu0 %v2572_v8  ;;  %2579 = vmatprep.subr.bf16.mxu1 %v3222_v29  ;;  %v3259_v56 = vrot.slane %v103_v54, %v212_v53  ;;  %v90_v58 = vld [vmem:[#allocation8 + $0x18] sm:$0xff]  ;;  %v89_v61 = vld [vmem:[#allocation8 + $0x10] sm:$0xff]  ;;  %v91_v5 = vld [vmem:[#allocation8 + $0x20] sm:$0xff]  ;;  %v3298_v27 = vrot.slane %v103_v54, %v208_v26 }
  0x42   :  { %v3261_v59 = vpack.c.bf16 %v90_v58, %v88_v57  ;;  %v3264_v63 = vpack.c.bf16 %v89_v61, %v87_v60  ;;  %v94_v3 = vld [vmem:[#allocation8 + $0x38] sm:$0xff]  ;;  %v93_v6 = vld [vmem:[#allocation8 + $0x30] sm:$0xff]  ;;  %v96_v8 = vld [vmem:[#allocation8 + $0x48] sm:$0xff] }
  0x43   :  { %v3270_v4 = vpack.c.bf16 %v94_v3, %v92_v0  ;;  %v3272_v7 = vpack.c.bf16 %v93_v6, %v91_v5  ;;  %v99_v21 = vld [vmem:[#allocation8 + $0x60] sm:$0xff]  ;;  %v101_v22 = vld [vmem:[#allocation8 + $0x70] sm:$0xff] }
  0x44   :  { %2470 = vmatmul.mubr.msk.f32.vlgmr.msra.gmra.mrb[0].mxu0 %vm110_vm1, %v104_v9  ;;  %2581 = vmatpush1.bf16.msra.mxu1 %v3232_v32  ;;  %v98_v9 = vld [vmem:[#allocation8 + $0x58] sm:$0xff]  ;;  %v3289_v23 = vpack.c.bf16 %v101_v22, %v99_v21 }
  0x45   :  { %379 = vmatprep.mubr.f32.mxu0 %v3083_v2  ;;  %2598 = vmatprep.subr.bf16.mxu1 %v3081_v1 }
  0x46   :  { %2583 = vmatprep.subr.bf16.mxu0 %v3261_v59 }
  0x47   :  { %2585 = vmatpush1.bf16.msra.mxu0 %v3264_v63 }
  0x48   :  { %2587 = vmatprep.subr.bf16.mxu0 %v3270_v4 }
  0x4b   :  { %2589 = vmatpush1.bf16.msra.mxu0 %v3272_v7 }
 0x117   :  { %v180_v11 = vpop.f32.mrb[0].mxu0 }
 0x118   :  { %v3195_v12 = vadd.f32 %v180_v11, %v109_v10  ;;  %v2471_v13 = vpop.f32.mrb[1].mxu0  ;;  %v95_v10 = vld [vmem:[#allocation8 + $0x40] sm:$0xff]  ;;  %v3275_v11 = vpack.c.bf16 %v98_v9, %v96_v8 }
 0x119   :  { %v97_v13 = vld [vmem:[#allocation8 + $0x50] sm:$0xff] }
 0x11a   :  { %2844 = vtanh.f32 %v3195_v12  ;;  %v2364_v15 = vmul.f32 -1.442695, %v3195_v12  ;;  %2591 = vmatprep.subr.bf16.mxu0 %v3275_v11 }
 0x11c   :  { %2846 = vpow2.f32 %v2364_v15 }
 0x124   :  { %v2845_v14 = vpop.eup %2844 }
 0x125   :  { %192 = vrot.lane.b32.xlu0 %v2845_v14, %s3084_s29  ;;  %v3279_v14 = vpack.c.bf16 %v97_v13, %v95_v10 }
 0x126   :  { %v2847_v16 = vpop.eup %2846 }
 0x127   :  { %v187_v17 = vadd.f32 1.0, %v2847_v16  ;;  %2593 = vmatpush1.bf16.msra.mxu0 %v3279_v14 }
 0x129   :  { %2848 = vrcp.f32 %v187_v17 }
 0x133   :  { %v2849_v18 = vpop.eup %2848 }
 0x197   :  { %v193_v19 = vpop.permute.xlu0 %192 }
 0x198   :  { %v195_v20 = vmul.f32 %v2849_v18, %v193_v19  ;;  %v102_v19 = vld [vmem:[#allocation8 + $0x78] sm:$0xff] }
 0x19a   :  { %2850 = vtanh.f32 %v195_v20 }
 0x1a4   :  { %v2851_v33 = vpop.eup %2850 }
 0x1a5   :  { %198 = vrot.lane.b32.xlu0 %v2851_v33, %s3085_s24 }
 0x1a9   :  { %465 = vrot.lane.b32.xlu0 %v195_v20, %s3084_s29 }
 0x217   :  { %v199_v34 = vpop.permute.xlu0 %198 }
 0x218   :  { %v201_v35 = vmul.f32 %v2849_v18, %v199_v34  ;;  %v100_v18 = vld [vmem:[#allocation8 + $0x68] sm:$0xff] }
 0x219   :  { %v3287_v20 = vpack.c.bf16 %v102_v19, %v100_v18 }
 0x21a   :  { %203 = vrot.lane.b32.xlu1 %v201_v35, %s3085_s24 }
 0x21b   :  { %2595 = vmatprep.subr.bf16.mxu0 %v3287_v20  ;;  %v466_v36 = vpop.permute.xlu0 %465 }
 0x21c   :  { %2597 = vmatpush1.bf16.msra.mxu0 %v3289_v23 }
 0x21d   :  { %2605 = vmatprep.subr.bf16.mxu0 %v3209_v24 }
 0x28c   :  { %v204_v41 = vpop.permute.xlu1 %203 }
 0x28d   :  { %2365 = vmatmul.mubr.msk.f32.vlgmr.msra.gmra.mrb[0].mxu1 %vm110_vm1, %v204_v41 }
 0x28e   :  { %2600 = vmatpush3.bf16.msra.mxu1 %v3240_v38  ;;  %2480 = vmatprep.mubr.msk.f32.mxu1 %vm3082_vm0, %v3083_v2 }
 0x28f   :  { %2601 = vmatprep.subr.bf16.mxu1 %v3081_v1 }
 0x292   :  { %2603 = vmatpush3.bf16.msra.mxu1 %v3244_v42 }
 0x293   :  { %2613 = vmatprep.subr.bf16.mxu1 %v3261_v59 }
 0x295   :  { %2481 = vmatmul.mubr.msk.f32.vlgmr.msra.gmra.mrb[2].mxu1 %vm110_vm1, %v204_v41 }
 0x296   :  { %665 = vmatprep.mubr.f32.mxu1 %v3083_v2  ;;  %2615 = vmatpush1.bf16.msra.mxu1 %v3264_v63 }
 0x297   :  { %2617 = vmatprep.subr.bf16.mxu1 %v3270_v4 }
 0x29a   :  { %2619 = vmatpush1.bf16.msra.mxu1 %v3272_v7 }
 0x29b   :  { %2621 = vmatprep.subr.bf16.mxu1 %v3275_v11 }
 0x29e   :  { %2623 = vmatpush1.bf16.msra.mxu1 %v3279_v14 }
 0x29f   :  { %2625 = vmatprep.subr.bf16.mxu1 %v3287_v20 }
 0x2a2   :  { %2627 = vmatpush1.bf16.msra.mxu1 %v3289_v23 }
 0x2a3   :  { %2635 = vmatprep.subr.bf16.mxu1 %v3209_v24 }
 0x360   :  { %v3252_v43 = vpop.f32.mrb[0].mxu1 }
 0x361   :  { %v286_v44 = vpop.f32.mrb[1].mxu1  ;;  %v285_v30 = vadd.f32 %v3252_v43, %v3298_v27 }
 0x362   :  { %v287_v62 = vadd.f32 %v286_v44, %v3259_v56 }
 0x363   :  { %v2366_v31 = vmul.f32 -1.442695, %v285_v30 }
 0x364   :  { %v2367_v33 = vmul.f32 -1.442695, %v287_v62 }
 0x368   :  { %v452_v45 = vpop.f32.mrb[2].mxu1 }
 0x369   :  { %v456_v46 = vadd.f32 %v452_v45, %v3195_v12  ;;  %v2482_v47 = vpop.f32.mrb[3].mxu1 }
 0x36b   :  { %2852 = vtanh.f32 %v456_v46  ;;  %v2370_v49 = vmul.f32 -1.442695, %v456_v46 }
 0x36d   :  { %2854 = vpow2.f32 %v2370_v49 }
 0x375   :  { %v2853_v48 = vpop.eup %2852 }
 0x376   :  { %470 = vrot.lane.b32.xlu1 %v2853_v48, %s3084_s29 }
 0x377   :  { %v2855_v52 = vpop.eup %2854 }
 0x378   :  { %v460_v55 = vadd.f32 1.0, %v2855_v52 }
 0x37a   :  { %2856 = vrcp.f32 %v460_v55 }
 0x37b   :  { %2858 = vtanh.f32 %v287_v62 }
 0x37c   :  { %2860 = vpow2.f32 %v2366_v31 }
 0x37d   :  { %2862 = vpow2.f32 %v2367_v33 }
 0x384   :  { %v2857_v15 = vpop.eup %2856 }
 0x385   :  { %v2859_v25 = vpop.eup %2858  ;;  %v468_v39 = vmul.f32 %v2857_v15, %v466_v36 }
 0x386   :  { %v2861_v34 = vpop.eup %2860 }
 0x387   :  { %v295_v35 = vadd.f32 1.0, %v2861_v34  ;;  %v2863_v37 = vpop.eup %2862 }
 0x388   :  { %v296_v44 = vadd.f32 1.0, %v2863_v37 }
 0x389   :  { %2864 = vrcp.f32 %v295_v35 }
 0x393   :  { %v2865_v45 = vpop.eup %2864 }
 0x3e8   :  { %v471_v16 = vpop.permute.xlu1 %470 }
 0x3e9   :  { %v473_v17 = vmul.f32 %v2857_v15, %v471_v16 }
 0x3eb   :  { %475 = vrot.lane.b32.xlu1 %v473_v17, %s3084_s29 }
 0x3ef   :  { %303 = vrot.lane.b32.xlu1 %v2859_v25, %s3085_s24 }
 0x45d   :  { %v476_v40 = vpop.permute.xlu1 %475 }
 0x45e   :  { %v3302_v41 = vadd.f32 %v476_v40, %v468_v39 }
 0x460   :  { %2866 = vtanh.f32 %v3302_v41 }
 0x461   :  { %v304_v46 = vpop.permute.xlu1 %303  ;;  %2868 = vrcp.f32 %v296_v44 }
 0x462   :  { %v306_v47 = vmul.f32 %v2865_v45, %v304_v46 }
 0x464   :  { %2870 = vtanh.f32 %v306_v47 }
 0x46a   :  { %v2867_v43 = vpop.eup %2866 }
 0x46b   :  { %481 = vrot.lane.b32.xlu0 %v2867_v43, %s3084_s29  ;;  %v2869_v48 = vpop.eup %2868 }
 0x46e   :  { %v2871_v49 = vpop.eup %2870 }
 0x46f   :  { %v308_v50 = vmul.f32 %v2871_v49, %v2869_v48 }
 0x471   :  { %310 = vst.msk [vmem:[#allocation2] sm:$0x1] %vm309_vm2, %v308_v50  ;;  %2368 = vmatmul.mubr.msk.f32.vlgmr.msra.gmra.mrb[2].mxu0 %vm311_vm3, %v308_v50 }
 0x472   :  { %2607 = vmatpush1.bf16.msra.mxu0 %v3220_v28  ;;  %554 = vmatprep.mubr.f32.mxu0 %v3083_v2 }
 0x473   :  { %2609 = vmatprep.subr.bf16.mxu0 %v3222_v29 }
 0x476   :  { %2611 = vmatpush1.bf16.msra.mxu0 %v3232_v32 }
 0x477   :  { %2628 = vmatprep.subr.bf16.mxu0 %v3081_v1 }
 0x4dd   :  { %v482_v51 = vpop.permute.xlu0 %481 }
 0x4de   :  { %v484_v52 = vmul.f32 %v2857_v15, %v482_v51 }
 0x4e0   :  { %486 = vrot.lane.b32.xlu0 %v484_v52, %s3085_s24 }
 0x552   :  { %v487_v53 = vpop.permute.xlu0 %486 }
 0x553   :  { %2371 = vmatmul.mubr.msk.f32.vlgmr.msra.gmra.mrb[2].mxu0 %vm110_vm1, %v487_v53 }
 0x554   :  { %2630 = vmatpush3.bf16.msra.mxu0 %v3240_v38  ;;  %2491 = vmatprep.mubr.msk.f32.mxu0 %vm3082_vm0, %v3083_v2 }
 0x555   :  { %2631 = vmatprep.subr.bf16.mxu0 %v3081_v1 }
 0x558   :  { %2633 = vmatpush3.bf16.msra.mxu0 %v3244_v42 }
 0x559   :  { %2643 = vmatprep.subr.bf16.mxu0 %v3261_v59 }
 0x55b   :  { %2492 = vmatmul.mubr.msk.f32.vlgmr.msra.gmra.mrb[4].mxu0 %vm110_vm1, %v487_v53 }
 0x55c   :  { %2645 = vmatpush1.bf16.msra.mxu0 %v3264_v63  ;;  %943 = vmatprep.mubr.f32.mxu0 %v3083_v2 }
 0x55d   :  { %2647 = vmatprep.subr.bf16.mxu0 %v3270_v4 }
 0x560   :  { %2649 = vmatpush1.bf16.msra.mxu0 %v3272_v7 }
 0x561   :  { %2651 = vmatprep.subr.bf16.mxu0 %v3275_v11 }
 0x564   :  { %2653 = vmatpush1.bf16.msra.mxu0 %v3279_v14 }
 0x565   :  { %2655 = vmatprep.subr.bf16.mxu0 %v3287_v20 }
 0x568   :  { %2657 = vmatpush1.bf16.msra.mxu0 %v3289_v23 }
 0x569   :  { %2665 = vmatprep.subr.bf16.mxu0 %v3209_v24 }
 0x626   :  { %v556_v54 = vpop.f32.mrb[2].mxu0 }
 0x627   :  { %v558_v55 = vpop.f32.mrb[3].mxu0  ;;  %v2804_v3 = vadd.f32 %v556_v54, %v3298_v27 }
 0x628   :  { %v2805_v57 = vadd.f32 %v558_v55, %v3259_v56 }
 0x629   :  { %v2372_v6 = vmul.f32 -1.442695, %v2804_v3 }
 0x62a   :  { %2872 = vtanh.f32 %v2805_v57  ;;  %v2373_v37 = vmul.f32 -1.442695, %v2805_v57 }
 0x62e   :  { %v738_v58 = vpop.f32.mrb[4].mxu0 }
 0x62f   :  { %v742_v60 = vadd.f32 %v738_v58, %v3195_v12  ;;  %v2493_v61 = vpop.f32.mrb[5].mxu0 }
 0x631   :  { %2874 = vtanh.f32 %v742_v60  ;;  %v2376_v5 = vmul.f32 -1.442695, %v742_v60 }
 0x633   :  { %2876 = vpow2.f32 %v2376_v5 }
 0x634   :  { %v2873_v62 = vpop.eup %2872  ;;  %2878 = vpow2.f32 %v2372_v6 }
 0x635   :  { %582 = vrot.lane.b32.xlu0 %v2873_v62, %s3085_s24 }
 0x639   :  { %577 = vrot.lane.b32.xlu0 %v306_v47, %s3085_s24 }
 0x63b   :  { %v2875_v0 = vpop.eup %2874 }
 0x63c   :  { %752 = vrot.lane.b32.xlu1 %v2875_v0, %s3084_s29 }
 0x63d   :  { %v2877_v8 = vpop.eup %2876 }
 0x63e   :  { %v746_v9 = vadd.f32 1.0, %v2877_v8  ;;  %v2879_v10 = vpop.eup %2878 }
 0x63f   :  { %v569_v13 = vadd.f32 1.0, %v2879_v10 }
 0x640   :  { %2880 = vrcp.f32 %v746_v9 }
 0x641   :  { %2882 = vrcp.f32 %v569_v13 }
 0x64a   :  { %v2881_v15 = vpop.eup %2880 }
 0x64b   :  { %v2883_v19 = vpop.eup %2882  ;;  %v750_v22 = vmul.f32 %v2881_v15, %v3302_v41 }
 0x6a7   :  { %v583_v18 = vpop.permute.xlu0 %582 }
 0x6a8   :  { %v585_v21 = vmul.f32 %v2883_v19, %v583_v18 }
 0x6ab   :  { %v578_v25 = vpop.permute.xlu0 %577 }
 0x6ac   :  { %v580_v31 = vmul.f32 %v2883_v19, %v578_v25 }
 0x6ae   :  { %v753_v16 = vpop.permute.xlu1 %752 }
 0x6af   :  { %v755_v17 = vmul.f32 %v2881_v15, %v753_v16 }
 0x6b1   :  { %757 = vrot.lane.b32.xlu1 %v755_v17, %s3084_s29 }
 0x6b5   :  { %587 = vrot.lane.b32.xlu1 %v585_v21, %s3085_s24 }
 0x723   :  { %v758_v26 = vpop.permute.xlu1 %757 }
 0x724   :  { %v3340_v30 = vadd.f32 %v758_v26, %v750_v22 }
 0x726   :  { %2884 = vtanh.f32 %v3340_v30 }
 0x727   :  { %v588_v33 = vpop.permute.xlu1 %587 }
 0x728   :  { %v3343_v34 = vadd.f32 %v588_v33, %v580_v31 }
 0x72a   :  { %2886 = vtanh.f32 %v3343_v34 }
 0x72b   :  { %2888 = vpow2.f32 %v2373_v37 }
 0x730   :  { %v2885_v35 = vpop.eup %2884 }
 0x731   :  { %763 = vrot.lane.b32.xlu0 %v2885_v35, %s3084_s29 }
 0x734   :  { %v2887_v36 = vpop.eup %2886 }
 0x735   :  { %593 = vrot.lane.b32.xlu1 %v2887_v36, %s3085_s24  ;;  %v2889_v39 = vpop.eup %2888 }
 0x736   :  { %v570_v40 = vadd.f32 1.0, %v2889_v39 }
 0x738   :  { %2890 = vrcp.f32 %v570_v40 }
 0x742   :  { %v2891_v45 = vpop.eup %2890 }
 0x7a3   :  { %v764_v41 = vpop.permute.xlu0 %763 }
 0x7a4   :  { %v766_v44 = vmul.f32 %v2881_v15, %v764_v41 }
 0x7a6   :  { %768 = vrot.lane.b32.xlu0 %v766_v44, %s3085_s24 }
 0x7a7   :  { %v594_v46 = vpop.permute.xlu1 %593 }
 0x7a8   :  { %v596_v47 = vmul.f32 %v2891_v45, %v594_v46 }
 0x7aa   :  { %597 = vst.msk [vmem:[#allocation2 + $0x1] sm:$0x1] %vm309_vm2, %v596_v47  ;;  %2374 = vmatmul.mubr.msk.f32.vlgmr.msra.gmra.mrb[4].mxu1 %vm311_vm3, %v596_v47 }
 0x7ab   :  { %2637 = vmatpush1.bf16.msra.mxu1 %v3220_v28  ;;  %836 = vmatprep.mubr.f32.mxu1 %v3083_v2 }
 0x7ac   :  { %2639 = vmatprep.subr.bf16.mxu1 %v3222_v29 }
 0x7af   :  { %2641 = vmatpush1.bf16.msra.mxu1 %v3232_v32 }
 0x7b0   :  { %2658 = vmatprep.subr.bf16.mxu1 %v3081_v1 }
 0x818   :  { %v769_v43 = vpop.permute.xlu0 %768 }
 0x819   :  { %2377 = vmatmul.mubr.msk.f32.vlgmr.msra.gmra.mrb[4].mxu1 %vm110_vm1, %v769_v43 }
 0x81a   :  { %2660 = vmatpush3.bf16.msra.mxu1 %v3240_v38  ;;  %2502 = vmatprep.mubr.msk.f32.mxu1 %vm3082_vm0, %v3083_v2 }
 0x81b   :  { %2661 = vmatprep.subr.bf16.mxu1 %v3081_v1 }
 0x81e   :  { %2663 = vmatpush3.bf16.msra.mxu1 %v3244_v42 }
 0x81f   :  { %2673 = vmatprep.subr.bf16.mxu1 %v3261_v59 }
 0x821   :  { %2503 = vmatmul.mubr.msk.f32.vlgmr.msra.gmra.mrb[6].mxu1 %vm110_vm1, %v769_v43 }
 0x822   :  { %2675 = vmatpush1.bf16.msra.mxu1 %v3264_v63  ;;  %1221 = vmatprep.mubr.f32.mxu1 %v3083_v2 }
 0x823   :  { %2677 = vmatprep.subr.bf16.mxu1 %v3270_v4 }
 0x826   :  { %2679 = vmatpush1.bf16.msra.mxu1 %v3272_v7 }
 0x827   :  { %2681 = vmatprep.subr.bf16.mxu1 %v3275_v11 }
 0x82a   :  { %2683 = vmatpush1.bf16.msra.mxu1 %v3279_v14 }
 0x82b   :  { %2685 = vmatprep.subr.bf16.mxu1 %v3287_v20 }
 0x82e   :  { %2687 = vmatpush1.bf16.msra.mxu1 %v3289_v23 }
 0x82f   :  { %2695 = vmatprep.subr.bf16.mxu1 %v3209_v24 }
 0x8ec   :  { %v838_v48 = vpop.f32.mrb[4].mxu1 }
 0x8ed   :  { %v840_v49 = vpop.f32.mrb[5].mxu1  ;;  %v2806_v57 = vadd.f32 %v838_v48, %v3298_v27 }
 0x8ee   :  { %v2807_v50 = vadd.f32 %v840_v49, %v3259_v56 }
 0x8ef   :  { %v2378_v58 = vmul.f32 -1.442695, %v2806_v57 }
 0x8f0   :  { %2892 = vtanh.f32 %v2807_v50  ;;  %v2379_v26 = vmul.f32 -1.442695, %v2807_v50 }
 0x8f4   :  { %v1016_v51 = vpop.f32.mrb[6].mxu1 }
 0x8f5   :  { %v1020_v52 = vadd.f32 %v1016_v51, %v3195_v12  ;;  %v2504_v53 = vpop.f32.mrb[7].mxu1 }
 0x8f7   :  { %2894 = vtanh.f32 %v1020_v52  ;;  %v2382_v60 = vmul.f32 -1.442695, %v1020_v52 }
 0x8f8   :  { %2896 = vpow2.f32 %v2378_v58 }
 0x8f9   :  { %2898 = vpow2.f32 %v2382_v60 }
 0x8fa   :  { %v2893_v54 = vpop.eup %2892 }
 0x8fb   :  { %860 = vrot.lane.b32.xlu0 %v2893_v54, %s3085_s24 }
 0x901   :  { %v2895_v55 = vpop.eup %2894 }
 0x902   :  { %1030 = vrot.lane.b32.xlu1 %v2895_v55, %s3084_s29  ;;  %v2897_v61 = vpop.eup %2896 }
 0x903   :  { %v851_v62 = vadd.f32 1.0, %v2897_v61  ;;  %v2899_v0 = vpop.eup %2898 }
 0x904   :  { %v1024_v3 = vadd.f32 1.0, %v2899_v0 }
 0x905   :  { %2900 = vrcp.f32 %v851_v62 }
 0x906   :  { %2902 = vrcp.f32 %v1024_v3 }
 0x90f   :  { %v2901_v5 = vpop.eup %2900 }
 0x910   :  { %v2903_v9 = vpop.eup %2902  ;;  %v858_v15 = vmul.f32 %v2901_v5, %v3343_v34 }
 0x911   :  { %v1028_v18 = vmul.f32 %v2903_v9, %v3340_v30 }
 0x96d   :  { %v861_v6 = vpop.permute.xlu0 %860 }
 0x96e   :  { %v863_v8 = vmul.f32 %v2901_v5, %v861_v6 }
 0x970   :  { %865 = vrot.lane.b32.xlu0 %v863_v8, %s3085_s24 }
 0x974   :  { %v1031_v10 = vpop.permute.xlu1 %1030 }
 0x975   :  { %v1033_v13 = vmul.f32 %v2903_v9, %v1031_v10 }
 0x977   :  { %1035 = vrot.lane.b32.xlu1 %v1033_v13, %s3084_s29 }
 0x9e2   :  { %v866_v16 = vpop.permute.xlu0 %865 }
 0x9e3   :  { %v3381_v17 = vadd.f32 %v866_v16, %v858_v15 }
 0x9e5   :  { %2904 = vtanh.f32 %v3381_v17 }
 0x9e9   :  { %v1036_v19 = vpop.permute.xlu1 %1035 }
 0x9ea   :  { %v3385_v21 = vadd.f32 %v1036_v19, %v1028_v18 }
 0x9ec   :  { %2906 = vtanh.f32 %v3385_v21 }
 0x9ed   :  { %2908 = vpow2.f32 %v2379_v26 }
 0x9ef   :  { %v2905_v22 = vpop.eup %2904 }
 0x9f0   :  { %871 = vrot.lane.b32.xlu0 %v2905_v22, %s3085_s24 }
 0x9f6   :  { %v2907_v25 = vpop.eup %2906 }
 0x9f7   :  { %1041 = vrot.lane.b32.xlu1 %v2907_v25, %s3084_s29  ;;  %v2909_v31 = vpop.eup %2908 }
 0x9f8   :  { %v852_v33 = vadd.f32 1.0, %v2909_v31 }
 0x9fa   :  { %2910 = vrcp.f32 %v852_v33 }
 0xa04   :  { %v2911_v34 = vpop.eup %2910 }
 0xa62   :  { %v872_v35 = vpop.permute.xlu0 %871 }
 0xa63   :  { %v874_v36 = vmul.f32 %v2911_v34, %v872_v35 }
 0xa65   :  { %875 = vst.msk [vmem:[#allocation2 + $0x2] sm:$0x1] %vm309_vm2, %v874_v36  ;;  %2380 = vmatmul.mubr.msk.f32.vlgmr.msra.gmra.mrb[6].mxu0 %vm311_vm3, %v874_v36 }
 0xa66   :  { %2667 = vmatpush1.bf16.msra.mxu0 %v3220_v28  ;;  %1114 = vmatprep.mubr.f32.mxu0 %v3083_v2 }
 0xa67   :  { %2669 = vmatprep.subr.bf16.mxu0 %v3222_v29 }
 0xa69   :  { %v1042_v30 = vpop.permute.xlu1 %1041 }
 0xa6a   :  { %v1044_v37 = vmul.f32 %v2903_v9, %v1042_v30  ;;  %2671 = vmatpush1.bf16.msra.mxu0 %v3232_v32 }
 0xa6b   :  { %2688 = vmatprep.subr.bf16.mxu0 %v3081_v1 }
 0xa6c   :  { %1046 = vrot.lane.b32.xlu1 %v1044_v37, %s3085_s24 }
 0xade   :  { %v1047_v39 = vpop.permute.xlu1 %1046 }
 0xadf   :  { %2383 = vmatmul.mubr.msk.f32.vlgmr.msra.gmra.mrb[6].mxu0 %vm110_vm1, %v1047_v39 }
 0xae0   :  { %2690 = vmatpush3.bf16.msra.mxu0 %v3240_v38  ;;  %2513 = vmatprep.mubr.msk.f32.mxu0 %vm3082_vm0, %v3083_v2 }
 0xae1   :  { %2691 = vmatprep.subr.bf16.mxu0 %v3081_v1 }
 0xae4   :  { %2693 = vmatpush3.bf16.msra.mxu0 %v3244_v42 }
 0xae5   :  { %2703 = vmatprep.subr.bf16.mxu0 %v3261_v59 }
 0xae7   :  { %2514 = vmatmul.mubr.msk.f32.vlgmr.msra.gmra.mrb[8].mxu0 %vm110_vm1, %v1047_v39 }
 0xae8   :  { %2705 = vmatpush1.bf16.msra.mxu0 %v3264_v63  ;;  %1499 = vmatprep.mubr.f32.mxu0 %v3083_v2 }
 0xae9   :  { %2707 = vmatprep.subr.bf16.mxu0 %v3270_v4 }
 0xaec   :  { %2709 = vmatpush1.bf16.msra.mxu0 %v3272_v7 }
 0xaed   :  { %2711 = vmatprep.subr.bf16.mxu0 %v3275_v11 }
 0xaf0   :  { %2713 = vmatpush1.bf16.msra.mxu0 %v3279_v14 }
 0xaf1   :  { %2715 = vmatprep.subr.bf16.mxu0 %v3287_v20 }
 0xaf4   :  { %2717 = vmatpush1.bf16.msra.mxu0 %v3289_v23 }
 0xaf5   :  { %2725 = vmatprep.subr.bf16.mxu0 %v3209_v24 }
 0xbb2   :  { %v1116_v40 = vpop.f32.mrb[6].mxu0 }
 0xbb3   :  { %v1118_v41 = vpop.f32.mrb[7].mxu0  ;;  %v2808_v49 = vadd.f32 %v1116_v40, %v3298_v27 }
 0xbb4   :  { %v2809_v44 = vadd.f32 %v1118_v41, %v3259_v56 }
 0xbb5   :  { %v2384_v50 = vmul.f32 -1.442695, %v2808_v49 }
 0xbb6   :  { %2912 = vtanh.f32 %v2809_v44  ;;  %v2385_v16 = vmul.f32 -1.442695, %v2809_v44 }
 0xbba   :  { %v1294_v45 = vpop.f32.mrb[8].mxu0 }
 0xbbb   :  { %v1298_v46 = vadd.f32 %v1294_v45, %v3195_v12  ;;  %v2515_v47 = vpop.f32.mrb[9].mxu0 }
 0xbbd   :  { %2914 = vtanh.f32 %v1298_v46  ;;  %v2388_v51 = vmul.f32 -1.442695, %v1298_v46 }
 0xbbe   :  { %2916 = vpow2.f32 %v2384_v50 }
 0xbbf   :  { %2918 = vpow2.f32 %v2388_v51 }
 0xbc0   :  { %v2913_v43 = vpop.eup %2912 }
 0xbc1   :  { %1138 = vrot.lane.b32.xlu1 %v2913_v43, %s3085_s24 }
 0xbc7   :  { %v2915_v48 = vpop.eup %2914 }
 0xbc8   :  { %1308 = vrot.lane.b32.xlu0 %v2915_v48, %s3084_s29  ;;  %v2917_v52 = vpop.eup %2916 }
 0xbc9   :  { %v1129_v53 = vadd.f32 1.0, %v2917_v52  ;;  %v2919_v54 = vpop.eup %2918 }
 0xbca   :  { %v1302_v55 = vadd.f32 1.0, %v2919_v54 }
 0xbcb   :  { %2920 = vrcp.f32 %v1129_v53 }
 0xbcc   :  { %2922 = vrcp.f32 %v1302_v55 }
 0xbd5   :  { %v2921_v57 = vpop.eup %2920 }
 0xbd6   :  { %v2923_v61 = vpop.eup %2922  ;;  %v1136_v3 = vmul.f32 %v2921_v57, %v3381_v17 }
 0xbd7   :  { %v1306_v8 = vmul.f32 %v2923_v61, %v3385_v21 }
 0xc33   :  { %v1139_v58 = vpop.permute.xlu1 %1138 }
 0xc34   :  { %v1141_v60 = vmul.f32 %v2921_v57, %v1139_v58 }
 0xc36   :  { %1143 = vrot.lane.b32.xlu1 %v1141_v60, %s3085_s24 }
 0xc3a   :  { %v1309_v62 = vpop.permute.xlu0 %1308 }
 0xc3b   :  { %v1311_v0 = vmul.f32 %v2923_v61, %v1309_v62 }
 0xc3d   :  { %1313 = vrot.lane.b32.xlu0 %v1311_v0, %s3084_s29 }
 0xca8   :  { %v1144_v5 = vpop.permute.xlu1 %1143 }
 0xca9   :  { %v3423_v6 = vadd.f32 %v1144_v5, %v1136_v3 }
 0xcab   :  { %2924 = vtanh.f32 %v3423_v6 }
 0xcaf   :  { %v1314_v9 = vpop.permute.xlu0 %1313 }
 0xcb0   :  { %v3427_v10 = vadd.f32 %v1314_v9, %v1306_v8 }
 0xcb2   :  { %2926 = vtanh.f32 %v3427_v10 }
 0xcb3   :  { %2928 = vpow2.f32 %v2385_v16 }
 0xcb5   :  { %v2925_v13 = vpop.eup %2924 }
 0xcb6   :  { %1149 = vrot.lane.b32.xlu1 %v2925_v13, %s3085_s24 }
 0xcbc   :  { %v2927_v15 = vpop.eup %2926 }
 0xcbd   :  { %1319 = vrot.lane.b32.xlu0 %v2927_v15, %s3084_s29  ;;  %v2929_v17 = vpop.eup %2928 }
 0xcbe   :  { %v1130_v18 = vadd.f32 1.0, %v2929_v17 }
 0xcc0   :  { %2930 = vrcp.f32 %v1130_v18 }
 0xcca   :  { %v2931_v19 = vpop.eup %2930 }
 0xd28   :  { %v1150_v22 = vpop.permute.xlu1 %1149 }
 0xd29   :  { %v1152_v25 = vmul.f32 %v2931_v19, %v1150_v22 }
 0xd2b   :  { %1153 = vst.msk [vmem:[#allocation2 + $0x3] sm:$0x1] %vm309_vm2, %v1152_v25  ;;  %2386 = vmatmul.mubr.msk.f32.vlgmr.msra.gmra.mrb[8].mxu1 %vm311_vm3, %v1152_v25 }
 0xd2c   :  { %2697 = vmatpush1.bf16.msra.mxu1 %v3220_v28  ;;  %1392 = vmatprep.mubr.f32.mxu1 %v3083_v2 }
 0xd2d   :  { %2699 = vmatprep.subr.bf16.mxu1 %v3222_v29 }
 0xd2f   :  { %v1320_v21 = vpop.permute.xlu0 %1319 }
 0xd30   :  { %v1322_v26 = vmul.f32 %v2923_v61, %v1320_v21  ;;  %2701 = vmatpush1.bf16.msra.mxu1 %v3232_v32 }
 0xd31   :  { %2718 = vmatprep.subr.bf16.mxu1 %v3081_v1 }
 0xd32   :  { %1324 = vrot.lane.b32.xlu0 %v1322_v26, %s3085_s24 }
 0xda4   :  { %v1325_v31 = vpop.permute.xlu0 %1324 }
 0xda5   :  { %2389 = vmatmul.mubr.msk.f32.vlgmr.msra.gmra.mrb[8].mxu1 %vm110_vm1, %v1325_v31 }
 0xda6   :  { %2720 = vmatpush3.bf16.msra.mxu1 %v3240_v38  ;;  %2524 = vmatprep.mubr.msk.f32.mxu1 %vm3082_vm0, %v3083_v2 }
 0xda7   :  { %2721 = vmatprep.subr.bf16.mxu1 %v3081_v1 }
 0xdaa   :  { %2723 = vmatpush3.bf16.msra.mxu1 %v3244_v42 }
 0xdab   :  { %2733 = vmatprep.subr.bf16.mxu1 %v3261_v59 }
 0xdad   :  { %2525 = vmatmul.mubr.msk.f32.vlgmr.msra.gmra.mrb[10].mxu1 %vm110_vm1, %v1325_v31 }
 0xdae   :  { %2735 = vmatpush1.bf16.msra.mxu1 %v3264_v63  ;;  %1777 = vmatprep.mubr.f32.mxu1 %v3083_v2 }
 0xdaf   :  { %2737 = vmatprep.subr.bf16.mxu1 %v3270_v4 }
 0xdb2   :  { %2739 = vmatpush1.bf16.msra.mxu1 %v3272_v7 }
 0xdb3   :  { %2741 = vmatprep.subr.bf16.mxu1 %v3275_v11 }
 0xdb6   :  { %2743 = vmatpush1.bf16.msra.mxu1 %v3279_v14 }
 0xdb7   :  { %2745 = vmatprep.subr.bf16.mxu1 %v3287_v20 }
 0xdba   :  { %2747 = vmatpush1.bf16.msra.mxu1 %v3289_v23 }
 0xdbb   :  { %2755 = vmatprep.subr.bf16.mxu1 %v3209_v24 }
 0xe78   :  { %v1394_v33 = vpop.f32.mrb[8].mxu1 }
 0xe79   :  { %v1396_v34 = vpop.f32.mrb[9].mxu1  ;;  %v2810_v41 = vadd.f32 %v1394_v33, %v3298_v27 }
 0xe7a   :  { %v2811_v35 = vadd.f32 %v1396_v34, %v3259_v56 }
 0xe7b   :  { %v2390_v44 = vmul.f32 -1.442695, %v2810_v41 }
 0xe7c   :  { %2932 = vtanh.f32 %v2811_v35  ;;  %v2391_v5 = vmul.f32 -1.442695, %v2811_v35 }
 0xe80   :  { %v1572_v36 = vpop.f32.mrb[10].mxu1 }
 0xe81   :  { %v1576_v30 = vadd.f32 %v1572_v36, %v3195_v12  ;;  %v2526_v37 = vpop.f32.mrb[11].mxu1 }
 0xe83   :  { %2934 = vtanh.f32 %v1576_v30  ;;  %v2394_v45 = vmul.f32 -1.442695, %v1576_v30 }
 0xe84   :  { %2936 = vpow2.f32 %v2390_v44 }
 0xe85   :  { %2938 = vpow2.f32 %v2394_v45 }
 0xe86   :  { %v2933_v39 = vpop.eup %2932 }
 0xe87   :  { %1416 = vrot.lane.b32.xlu0 %v2933_v39, %s3085_s24 }
 0xe8d   :  { %v2935_v40 = vpop.eup %2934 }
 0xe8e   :  { %1586 = vrot.lane.b32.xlu1 %v2935_v40, %s3084_s29  ;;  %v2937_v46 = vpop.eup %2936 }
 0xe8f   :  { %v1407_v47 = vadd.f32 1.0, %v2937_v46  ;;  %v2939_v43 = vpop.eup %2938 }
 0xe90   :  { %v1580_v48 = vadd.f32 1.0, %v2939_v43 }
 0xe91   :  { %2940 = vrcp.f32 %v1407_v47 }
 0xe92   :  { %2942 = vrcp.f32 %v1580_v48 }
 0xe9b   :  { %v2941_v49 = vpop.eup %2940 }
 0xe9c   :  { %v2943_v52 = vpop.eup %2942  ;;  %v1414_v55 = vmul.f32 %v2941_v49, %v3423_v6 }
 0xe9d   :  { %v1584_v60 = vmul.f32 %v2943_v52, %v3427_v10 }
 0xef9   :  { %v1417_v50 = vpop.permute.xlu0 %1416 }
 0xefa   :  { %v1419_v51 = vmul.f32 %v2941_v49, %v1417_v50 }
 0xefc   :  { %1421 = vrot.lane.b32.xlu0 %v1419_v51, %s3085_s24 }
 0xf00   :  { %v1587_v53 = vpop.permute.xlu1 %1586 }
 0xf01   :  { %v1589_v54 = vmul.f32 %v2943_v52, %v1587_v53 }
 0xf03   :  { %1591 = vrot.lane.b32.xlu1 %v1589_v54, %s3084_s29 }
 0xf6e   :  { %v1422_v57 = vpop.permute.xlu0 %1421 }
 0xf6f   :  { %v3465_v58 = vadd.f32 %v1422_v57, %v1414_v55 }
 0xf71   :  { %2944 = vtanh.f32 %v3465_v58 }
 0xf75   :  { %v1592_v61 = vpop.permute.xlu1 %1591 }
 0xf76   :  { %v3469_v62 = vadd.f32 %v1592_v61, %v1584_v60 }
 0xf78   :  { %2946 = vtanh.f32 %v3469_v62 }
 0xf79   :  { %2948 = vpow2.f32 %v2391_v5 }
 0xf7b   :  { %v2945_v0 = vpop.eup %2944 }
 0xf7c   :  { %1427 = vrot.lane.b32.xlu0 %v2945_v0, %s3085_s24 }
 0xf82   :  { %v2947_v3 = vpop.eup %2946 }
 0xf83   :  { %1597 = vrot.lane.b32.xlu1 %v2947_v3, %s3084_s29  ;;  %v2949_v6 = vpop.eup %2948 }
 0xf84   :  { %v1408_v8 = vadd.f32 1.0, %v2949_v6 }
 0xf86   :  { %2950 = vrcp.f32 %v1408_v8 }
 0xf90   :  { %v2951_v9 = vpop.eup %2950 }
 0xfee   :  { %v1428_v13 = vpop.permute.xlu0 %1427 }
 0xfef   :  { %v1430_v15 = vmul.f32 %v2951_v9, %v1428_v13 }
 0xff1   :  { %1431 = vst.msk [vmem:[#allocation2 + $0x4] sm:$0x1] %vm309_vm2, %v1430_v15  ;;  %2392 = vmatmul.mubr.msk.f32.vlgmr.msra.gmra.mrb[10].mxu0 %vm311_vm3, %v1430_v15 }
 0xff2   :  { %2727 = vmatpush1.bf16.msra.mxu0 %v3220_v28  ;;  %1670 = vmatprep.mubr.f32.mxu0 %v3083_v2 }
 0xff3   :  { %2729 = vmatprep.subr.bf16.mxu0 %v3222_v29 }
 0xff5   :  { %v1598_v10 = vpop.permute.xlu1 %1597 }
 0xff6   :  { %v1600_v16 = vmul.f32 %v2943_v52, %v1598_v10  ;;  %2731 = vmatpush1.bf16.msra.mxu0 %v3232_v32 }
 0xff7   :  { %2748 = vmatprep.subr.bf16.mxu0 %v3081_v1 }
 0xff8   :  { %1602 = vrot.lane.b32.xlu1 %v1600_v16, %s3085_s24 }
0x106a   :  { %v1603_v17 = vpop.permute.xlu1 %1602 }
0x106b   :  { %2395 = vmatmul.mubr.msk.f32.vlgmr.msra.gmra.mrb[10].mxu0 %vm110_vm1, %v1603_v17 }
0x106c   :  { %2750 = vmatpush3.bf16.msra.mxu0 %v3240_v38  ;;  %2535 = vmatprep.mubr.msk.f32.mxu0 %vm3082_vm0, %v3083_v2 }
0x106d   :  { %2751 = vmatprep.subr.bf16.mxu0 %v3081_v1 }
0x1070   :  { %2753 = vmatpush3.bf16.msra.mxu0 %v3244_v42 }
0x1071   :  { %2763 = vmatprep.subr.bf16.mxu0 %v3261_v59 }
0x1073   :  { %2536 = vmatmul.mubr.msk.f32.vlgmr.msra.gmra.mrb[12].mxu0 %vm110_vm1, %v1603_v17 }
0x1074   :  { %2765 = vmatpush1.bf16.msra.mxu0 %v3264_v63  ;;  %2055 = vmatprep.mubr.f32.mxu0 %v3083_v2 }
0x1075   :  { %2767 = vmatprep.subr.bf16.mxu0 %v3270_v4 }
0x1078   :  { %2769 = vmatpush1.bf16.msra.mxu0 %v3272_v7 }
0x1079   :  { %2771 = vmatprep.subr.bf16.mxu0 %v3275_v11 }
0x107c   :  { %2773 = vmatpush1.bf16.msra.mxu0 %v3279_v14 }
0x107d   :  { %2775 = vmatprep.subr.bf16.mxu0 %v3287_v20 }
0x1080   :  { %2777 = vmatpush1.bf16.msra.mxu0 %v3289_v23 }
0x1081   :  { %2785 = vmatprep.subr.bf16.mxu0 %v3209_v24 }
0x113e   :  { %v1672_v59 = vpop.f32.mrb[10].mxu0 }
0x113f   :  { %v1674_v18 = vpop.f32.mrb[11].mxu0  ;;  %v2812_v14 = vadd.f32 %v1672_v59, %v3298_v27 }
0x1140   :  { %v2813_v63 = vadd.f32 %v1674_v18, %v3259_v56 }
0x1141   :  { %v2396_v20 = vmul.f32 -1.442695, %v2812_v14 }
0x1142   :  { %2952 = vtanh.f32 %v2813_v63  ;;  %v2397_v43 = vmul.f32 -1.442695, %v2813_v63 }
0x1146   :  { %v1850_v19 = vpop.f32.mrb[12].mxu0 }
0x1147   :  { %v1854_v4 = vadd.f32 %v1850_v19, %v3195_v12  ;;  %v2537_v22 = vpop.f32.mrb[13].mxu0 }
0x1149   :  { %2954 = vtanh.f32 %v1854_v4  ;;  %v2400_v24 = vmul.f32 -1.442695, %v1854_v4 }
0x114a   :  { %2956 = vpow2.f32 %v2396_v20 }
0x114b   :  { %2958 = vpow2.f32 %v2400_v24 }
0x114c   :  { %v2953_v7 = vpop.eup %2952 }
0x114d   :  { %1694 = vrot.lane.b32.xlu1 %v2953_v7, %s3085_s24 }
0x1153   :  { %v2955_v11 = vpop.eup %2954 }
0x1154   :  { %1864 = vrot.lane.b32.xlu0 %v2955_v11, %s3084_s29  ;;  %v2957_v23 = vpop.eup %2956 }
0x1155   :  { %v1685_v25 = vadd.f32 1.0, %v2957_v23  ;;  %v2959_v21 = vpop.eup %2958 }
0x1156   :  { %v1858_v26 = vadd.f32 1.0, %v2959_v21 }
0x1157   :  { %2960 = vrcp.f32 %v1685_v25 }
0x1158   :  { %2962 = vrcp.f32 %v1858_v26 }
0x1161   :  { %v2961_v31 = vpop.eup %2960 }
0x1162   :  { %v2963_v35 = vpop.eup %2962  ;;  %v1692_v37 = vmul.f32 %v2961_v31, %v3465_v58 }
0x1163   :  { %v1862_v41 = vmul.f32 %v2963_v35, %v3469_v62 }
0x11bf   :  { %v1695_v33 = vpop.permute.xlu1 %1694 }
0x11c0   :  { %v1697_v34 = vmul.f32 %v2961_v31, %v1695_v33 }
0x11c2   :  { %1699 = vrot.lane.b32.xlu1 %v1697_v34, %s3085_s24 }
0x11c6   :  { %v1865_v36 = vpop.permute.xlu0 %1864 }
0x11c7   :  { %v1867_v30 = vmul.f32 %v2963_v35, %v1865_v36 }
0x11c9   :  { %1869 = vrot.lane.b32.xlu0 %v1867_v30, %s3084_s29 }
0x1234   :  { %v1700_v39 = vpop.permute.xlu1 %1699 }
0x1235   :  { %v3507_v40 = vadd.f32 %v1700_v39, %v1692_v37 }
0x1237   :  { %2964 = vtanh.f32 %v3507_v40 }
0x123b   :  { %v1870_v44 = vpop.permute.xlu0 %1869 }
0x123c   :  { %v3511_v45 = vadd.f32 %v1870_v44, %v1862_v41 }
0x123e   :  { %2966 = vtanh.f32 %v3511_v45 }
0x123f   :  { %2968 = vpow2.f32 %v2397_v43 }
0x1241   :  { %v2965_v46 = vpop.eup %2964 }
0x1242   :  { %1705 = vrot.lane.b32.xlu1 %v2965_v46, %s3085_s24 }
0x1248   :  { %v2967_v47 = vpop.eup %2966 }
0x1249   :  { %1875 = vrot.lane.b32.xlu0 %v2967_v47, %s3084_s29  ;;  %v2969_v48 = vpop.eup %2968  ;;  %v2270_v47 = vld [vmem:[%s3597_s7 + $0x18] sm:$0xff] }
0x124a   :  { %v1686_v49 = vadd.f32 1.0, %v2969_v48 }
0x124c   :  { %2970 = vrcp.f32 %v1686_v49 }
0x1256   :  { %v2971_v50 = vpop.eup %2970 }
0x12b4   :  { %v1706_v51 = vpop.permute.xlu1 %1705 }
0x12b5   :  { %v1708_v52 = vmul.f32 %v2971_v50, %v1706_v51  ;;  %v2271_v51 = vld [vmem:[%s3597_s7 + $0x20] sm:$0xff] }
0x12b7   :  { %1709 = vst.msk [vmem:[#allocation2 + $0x5] sm:$0x1] %vm309_vm2, %v1708_v52  ;;  %2398 = vmatmul.mubr.msk.f32.vlgmr.msra.gmra.mrb[12].mxu1 %vm311_vm3, %v1708_v52  ;;  %v2272_v52 = vld [vmem:[%s3597_s7 + $0x28] sm:$0xff] }
0x12b8   :  { %2757 = vmatpush1.bf16.msra.mxu1 %v3220_v28  ;;  %1948 = vmatprep.mubr.f32.mxu1 %v3083_v2 }
0x12b9   :  { %2759 = vmatprep.subr.bf16.mxu1 %v3222_v29 }
0x12bb   :  { %v1876_v53 = vpop.permute.xlu0 %1875 }
0x12bc   :  { %v1878_v54 = vmul.f32 %v2963_v35, %v1876_v53  ;;  %2761 = vmatpush1.bf16.msra.mxu1 %v3232_v32  ;;  %v2799_v53 = vpack.c.bf16 %v2272_v52, %v2271_v51 }
0x12bd   :  { %2778 = vmatprep.subr.bf16.mxu1 %v3081_v1 }
0x12be   :  { %1880 = vrot.lane.b32.xlu0 %v1878_v54, %s3085_s24  ;;  %v2273_v54 = vld [vmem:[%s3597_s7 + $0x30] sm:$0xff] }
0x1330   :  { %v1881_v55 = vpop.permute.xlu0 %1880 }
0x1331   :  { %2401 = vmatmul.mubr.msk.f32.vlgmr.msra.gmra.mrb[12].mxu1 %vm110_vm1, %v1881_v55 }
0x1332   :  { %2780 = vmatpush3.bf16.msra.mxu1 %v3240_v38  ;;  %2546 = vmatprep.mubr.msk.f32.mxu1 %vm3082_vm0, %v3083_v2 }
0x1333   :  { %2781 = vmatprep.subr.bf16.mxu1 %v3081_v1 }
0x1336   :  { %2783 = vmatpush3.bf16.msra.mxu1 %v3244_v42 }
0x1337   :  { %2792 = vmatprep.subr.bf16.mxu1 %v3081_v1 }
0x1339   :  { %2547 = vmatmul.mubr.msk.f32.vlgmr.msra.gmra.mrb[14].mxu1 %vm110_vm1, %v1881_v55  ;;  %v2274_v55 = vld [vmem:[%s3597_s7 + $0x38] sm:$0xff] }
0x133a   :  { %2565 = vmatprep.mubr.msk.f32.mxu1 %vm3082_vm0, %v3083_v2 }
0x1404   :  { %v1950_v57 = vpop.f32.mrb[12].mxu1 }
0x1405   :  { %v1952_v58 = vpop.f32.mrb[13].mxu1  ;;  %v2814_v3 = vadd.f32 %v1950_v57, %v3298_v27  ;;  %v2802_v57 = vpack.c.bf16 %v2274_v55, %v2273_v54 }
0x1406   :  { %v2815_v60 = vadd.f32 %v1952_v58, %v3259_v56 }
0x1407   :  { %v2402_v5 = vmul.f32 -1.442695, %v2814_v3 }
0x1408   :  { %2972 = vtanh.f32 %v2815_v60  ;;  %v2403_v24 = vmul.f32 -1.442695, %v2815_v60 }
0x140c   :  { %v2128_v38 = vpop.f32.mrb[14].mxu1 }
0x140d   :  { %v2132_v61 = vadd.f32 %v2128_v38, %v3195_v12  ;;  %v2548_v62 = vpop.f32.mrb[15].mxu1 }
0x140f   :  { %2974 = vtanh.f32 %v2132_v61  ;;  %v2406_v6 = vmul.f32 -1.442695, %v2132_v61 }
0x1410   :  { %2976 = vpow2.f32 %v2402_v5  ;;  %v2410_v5 = vld [vmem:[#allocation3] ss:$0 sm:$0xff] }
0x1411   :  { %2978 = vpow2.f32 %v2406_v6 }
0x1412   :  { %v2973_v0 = vpop.eup %2972 }
0x1413   :  { %1972 = vrot.lane.b32.xlu0 %v2973_v0, %s3085_s24 }
0x1419   :  { %v2975_v42 = vpop.eup %2974 }
0x141a   :  { %2142 = vrot.lane.b32.xlu1 %v2975_v42, %s3084_s29  ;;  %v2977_v8 = vpop.eup %2976 }
0x141b   :  { %v1963_v9 = vadd.f32 1.0, %v2977_v8  ;;  %v2979_v13 = vpop.eup %2978 }
0x141c   :  { %v2136_v15 = vadd.f32 1.0, %v2979_v13 }
0x141d   :  { %2980 = vrcp.f32 %v1963_v9 }
0x141e   :  { %2982 = vrcp.f32 %v2136_v15 }
0x1427   :  { %v2981_v12 = vpop.eup %2980 }
0x1428   :  { %v2983_v17 = vpop.eup %2982  ;;  %v1970_v63 = vmul.f32 %v2981_v12, %v3507_v40 }
0x1429   :  { %v2140_v22 = vmul.f32 %v2983_v17, %v3511_v45  ;;  %v2268_v45 = vld [vmem:[%s3597_s7 + $0x8] sm:$0xff] }
0x1485   :  { %v1973_v10 = vpop.permute.xlu0 %1972 }
0x1486   :  { %v1975_v16 = vmul.f32 %v2981_v12, %v1973_v10 }
0x1488   :  { %1977 = vrot.lane.b32.xlu0 %v1975_v16, %s3085_s24 }
0x148c   :  { %v2143_v59 = vpop.permute.xlu1 %2142 }
0x148d   :  { %v2145_v18 = vmul.f32 %v2983_v17, %v2143_v59 }
0x148f   :  { %2147 = vrot.lane.b32.xlu1 %v2145_v18, %s3084_s29 }
0x14fa   :  { %v1978_v19 = vpop.permute.xlu0 %1977 }
0x14fb   :  { %v1980_v4 = vadd.f32 %v1978_v19, %v1970_v63 }
0x14fd   :  { %2984 = vtanh.f32 %v1980_v4 }
0x1501   :  { %v2148_v7 = vpop.permute.xlu1 %2147 }
0x1502   :  { %v2150_v11 = vadd.f32 %v2148_v7, %v2140_v22 }
0x1504   :  { %2986 = vtanh.f32 %v2150_v11 }
0x1505   :  { %2988 = vpow2.f32 %v2403_v24 }
0x1507   :  { %v2985_v14 = vpop.eup %2984 }
0x1508   :  { %1983 = vrot.lane.b32.xlu0 %v2985_v14, %s3085_s24 }
0x150e   :  { %v2987_v20 = vpop.eup %2986 }
0x150f   :  { %2153 = vrot.lane.b32.xlu1 %v2987_v20, %s3084_s29  ;;  %v2989_v23 = vpop.eup %2988 }
0x1510   :  { %v1964_v25 = vadd.f32 1.0, %v2989_v23 }
0x1512   :  { %2990 = vrcp.f32 %v1964_v25 }
0x151c   :  { %v2991_v21 = vpop.eup %2990 }
0x157a   :  { %v1984_v26 = vpop.permute.xlu0 %1983 }
0x157b   :  { %v1986_v31 = vmul.f32 %v2991_v21, %v1984_v26 }
0x157d   :  { %1987 = vst.msk [vmem:[#allocation2 + $0x6] sm:$0x1] %vm309_vm2, %v1986_v31  ;;  %2404 = vmatmul.mubr.msk.f32.vlgmr.msra.gmra.mrb[14].mxu0 %vm311_vm3, %v1986_v31 }
0x157e   :  { %2787 = vmatpush1.bf16.msra.mxu0 %v3220_v28  ;;  %2226 = vmatprep.mubr.f32.mxu0 %v3083_v2 }
0x157f   :  { %2789 = vmatprep.subr.bf16.mxu0 %v3222_v29 }
0x1581   :  { %v2154_v33 = vpop.permute.xlu1 %2153 }
0x1582   :  { %v2156_v34 = vmul.f32 %v2983_v17, %v2154_v33  ;;  %2791 = vmatpush1.bf16.msra.mxu0 %v3232_v32 }
0x1584   :  { %2158 = vrot.lane.b32.xlu1 %v2156_v34, %s3085_s24 }
0x15f6   :  { %v2159_v35 = vpop.permute.xlu1 %2158 }
0x15f7   :  { %2407 = vmatmul.mubr.msk.f32.vlgmr.msra.gmra.mrb[14].mxu0 %vm110_vm1, %v2159_v35 }
0x16ca   :  { %v2228_v36 = vpop.f32.mrb[14].mxu0 }
0x16cb   :  { %v2230_v30 = vpop.f32.mrb[15].mxu0  ;;  %v2816_v2 = vadd.f32 %v2228_v36, %v3298_v27  ;;  %v2269_v27 = vld [vmem:[%s3597_s7 + $0x10] sm:$0xff] }
0x16cc   :  { %v2817_v37 = vadd.f32 %v2230_v30, %v3259_v56  ;;  %v2267_v56 = vld [vmem:[%s3597_s7] sm:$0xff]  ;;  %v2796_v43 = vpack.c.bf16 %v2270_v47, %v2269_v27 }
0x16cd   :  { %v2408_v28 = vmul.f32 -1.442695, %v2816_v2  ;;  %v2793_v46 = vpack.c.bf16 %v2268_v45, %v2267_v56 }
0x16ce   :  { %2992 = vtanh.f32 %v2817_v37  ;;  %v2409_v60 = vmul.f32 -1.442695, %v2817_v37 }
0x16cf   :  { %2994 = vpow2.f32 %v2408_v28  ;;  %2794 = vmatpush3.bf16.msra.mxu1 %v2793_v46 }
0x16d0   :  { %2795 = vmatprep.subr.bf16.mxu1 %v3081_v1 }
0x16d3   :  { %2797 = vmatpush3.bf16.msra.mxu1 %v2796_v43 }
0x16d4   :  { %2798 = vmatprep.subr.bf16.mxu1 %v3081_v1 }
0x16d7   :  { %2800 = vmatpush3.bf16.msra.mxu1 %v2799_v53 }
0x16d8   :  { %v2993_v39 = vpop.eup %2992  ;;  %2801 = vmatprep.subr.bf16.mxu1 %v3081_v1 }
0x16d9   :  { %2250 = vrot.lane.b32.xlu0 %v2993_v39, %s3085_s24  ;;  %v2995_v29 = vpop.eup %2994 }
0x16da   :  { %v2241_v40 = vadd.f32 1.0, %v2995_v29 }
0x16db   :  { %2803 = vmatpush3.bf16.msra.mxu1 %v2802_v57 }
0x16dc   :  { %2996 = vrcp.f32 %v2241_v40 }
0x16e6   :  { %v2997_v32 = vpop.eup %2996 }
0x16e7   :  { %v2248_v48 = vmul.f32 %v2997_v32, %v1980_v4 }
0x174b   :  { %v2251_v41 = vpop.permute.xlu0 %2250 }
0x174c   :  { %v2253_v44 = vmul.f32 %v2997_v32, %v2251_v41 }
0x174e   :  { %2255 = vrot.lane.b32.xlu1 %v2253_v44, %s3085_s24 }
0x17c0   :  { %v2256_v49 = vpop.permute.xlu1 %2255 }
0x17c1   :  { %v2258_v50 = vadd.f32 %v2256_v49, %v2248_v48 }
0x17c3   :  { %2998 = vtanh.f32 %v2258_v50 }
0x17c4   :  { %3000 = vpow2.f32 %v2409_v60 }
0x17cd   :  { %v2999_v58 = vpop.eup %2998 }
0x17ce   :  { %2261 = vrot.lane.b32.xlu0 %v2999_v58, %s3085_s24  ;;  %v3001_v38 = vpop.eup %3000 }
0x17cf   :  { %v2242_v61 = vadd.f32 1.0, %v3001_v38 }
0x17d1   :  { %3002 = vrcp.f32 %v2242_v61 }
0x17db   :  { %v3003_v62 = vpop.eup %3002 }
0x1840   :  { %v2262_v0 = vpop.permute.xlu0 %2261 }
0x1841   :  { %v2264_v42 = vmul.f32 %v3003_v62, %v2262_v0 }
0x1843   :  { %2265 = vst.msk [vmem:[#allocation2 + $0x7] sm:$0x1] %vm309_vm2, %v2264_v42 }
0x184a   :  { %v2266_v3 = vld [vmem:[#allocation2] sm:$0xff] }
0x184b   :  { %2566 = vmatmul.mubr.msk.f32.vlgmr.msra.gmra.mrb[16].mxu1 %vm311_vm3, %v2266_v3 }
0x191e   :  { %v2351_v6 = vpop.f32.mrb[16].mxu1 }
0x191f   :  { %v2352_v1 = vadd.f32 %v2410_v5, %v2351_v6  ;;  %v2567_v8 = vpop.f32.mrb[17].mxu1 }
0x1921   :  { %2356 = vst.msk [vmem:[%s3599_s9] sm:$0xff] %vm2355_vm4, %v2352_v1 }
0x1922   :  { %2361 = vsyncpa [#allocation5], 1 }
0x1923   :  { %2362 = vsyncpa [#allocation7], 1 }

</bundles_post_ra>
